<compile_context>
chip_gen: v5e
topology: v5e:2x2
jax: 0.10.0
libtpu: 0.0.40
codegen_flags: <defaults>
</compile_context>

<pallas_src>
import jax
import jax.numpy as jnp
from jax import lax
from jax.experimental import pallas as pl
from jax.experimental.pallas import tpu as pltpu


def _round_up(n, m):
    return ((n + m - 1) // m) * m


def mlp_kernel(x_ref, w1_ref, b1_ref, w2_ref, b2_ref, w3_ref, b3_ref, o_ref):
    # Layer 1: (tm,1024) @ (1024,512) on MXU; x cast f32->bf16 in-kernel (VPU,
    # hides under the MXU slot) so the wrapper never makes an extra HBM pass.
    x_bf = x_ref[...].astype(jnp.bfloat16)
    h1 = jnp.dot(x_bf, w1_ref[...], preferred_element_type=jnp.float32)
    h1 = jnp.maximum(h1 + b1_ref[...], 0.0)

    # Layer 2: (tm,512) @ (512,128) on MXU + bias + ReLU.
    h2 = jnp.dot(h1.astype(jnp.bfloat16), w2_ref[...],
                 preferred_element_type=jnp.float32)
    h2 = jnp.maximum(h2 + b2_ref[...], 0.0)

    # Layer 3 (N=1): lane-dense epilogue.  Contract w3 (1,128) with h2 (tm,128)
    # on the 128-dim to get a (1, tm) row -- result lands lane-major, so the
    # store is a plain unmasked vst (no XLU lane reduce, no (tm,1) masked store).
    y = lax.dot_general(w3_ref[...], h2.astype(jnp.bfloat16),
                        dimension_numbers=(((1,), (1,)), ((), ())),
                        preferred_element_type=jnp.float32)
    o_ref[...] = (y + b3_ref[0, 0]).astype(o_ref.dtype)


def mlp_forward(x, w1, b1, w2, b2, w3, b3, *, tile_m=1024):
    """x: (B, 1024) f32.  Returns (B,) f32 (matches torch .squeeze())."""
    B = x.shape[0]

    # Pad B only to the f32 sublane multiple (8), never all the way to tile_m.
    b_pad = _round_up(B, 8)
    if b_pad != B:
        x = jnp.pad(x, ((0, b_pad - B), (0, 0)))

    tm = min(_round_up(tile_m, 8), b_pad)
    # v7x megacore: for large batches keep >= 2 tiles so dimension_semantics
    # ("parallel",) can actually shard work across both TensorCores.
    if b_pad >= 1024 and pl.cdiv(b_pad, tm) < 2:
        tm = _round_up(pl.cdiv(b_pad, 2), 8)
    n_tiles = pl.cdiv(b_pad, tm)

    # bf16 weights (f32 MXU accumulation); biases stay f32.  These casts are
    # tiny (~1.3 MiB total) and constant-fold when the params are static /
    # pre-cast upstream.
    w1_bf = w1.astype(jnp.bfloat16)
    w2_bf = w2.astype(jnp.bfloat16)
    w3_bf = w3.astype(jnp.bfloat16)

    flops = 2 * b_pad * (1024 * 512 + 512 * 128 + 128)
    bytes_accessed = (
        b_pad * 1024 * 4          # x (f32, read once by the kernel)
        + 1024 * 512 * 2          # w1 (bf16)
        + 512 * 128 * 2           # w2 (bf16)
        + 128 * 2                 # w3 (bf16)
        + (512 + 128 + 1) * 4     # biases (f32)
        + n_tiles * tm * 4        # output (f32)
    )

    out = pl.pallas_call(
        mlp_kernel,
        out_shape=jax.ShapeDtypeStruct((n_tiles, tm), jnp.float32),
        grid=(n_tiles,),
        in_specs=[
            pl.BlockSpec((tm, 1024), lambda i: (i, 0)),      # x tile (pipelined)
            pl.BlockSpec((1024, 512), lambda i: (0, 0)),     # w1 (VMEM-resident)
            pl.BlockSpec((1, 512), lambda i: (0, 0)),        # b1
            pl.BlockSpec((512, 128), lambda i: (0, 0)),      # w2
            pl.BlockSpec((1, 128), lambda i: (0, 0)),        # b2
            pl.BlockSpec((1, 128), lambda i: (0, 0)),        # w3 (row vector)
            pl.BlockSpec(memory_space=pltpu.MemorySpace.SMEM),  # b3 scalar
        ],
        out_specs=pl.BlockSpec((1, tm), lambda i: (i, 0)),   # lane-dense output
        compiler_params=pltpu.CompilerParams(
            dimension_semantics=("parallel",),   # batch tiles over TCs (v7x)
            vmem_limit_bytes=32 * 1024 * 1024,   # ~12 MiB used at tm=1024
        ),
        cost_estimate=pl.CostEstimate(
            flops=flops, transcendentals=0, bytes_accessed=bytes_accessed),
    )(x, w1_bf, b1, w2_bf, b2, w3_bf, b3)

    # (n_tiles, tm) -> flat batch order; drop padded / partial-tile garbage.
    # jnp.squeeze matches torch .squeeze(): (1,) -> () when B == 1.
    return jnp.squeeze(out.reshape(-1)[:B])


def mlp_reference(x, w1, b1, w2, b2, w3, b3):
    """Plain-JAX reference with the same bf16-weight / f32-accumulate recipe."""
    xb = x.astype(jnp.bfloat16)
    h1 = jnp.maximum(
        jnp.dot(xb, w1.astype(jnp.bfloat16),
                preferred_element_type=jnp.float32) + b1, 0.0)
    h2 = jnp.maximum(
        jnp.dot(h1.astype(jnp.bfloat16), w2.astype(jnp.bfloat16),
                preferred_element_type=jnp.float32) + b2, 0.0)
    y = jnp.dot(h2.astype(jnp.bfloat16), w3.astype(jnp.bfloat16).T,
                preferred_element_type=jnp.float32) + b3
    return jnp.squeeze(y)


def init_params(key):
    # Deterministic synthetic init (shapes consistent with the torch Linear layers).
    k1, k2, k3, k4, k5, k6 = jax.random.split(key, 6)
    w1 = jax.random.normal(k1, (1024, 512), jnp.float32) * (1.0 / jnp.sqrt(1024.0))
    b1 = jax.random.normal(k2, (1, 512), jnp.float32) * 0.01
    w2 = jax.random.normal(k3, (512, 128), jnp.float32) * (1.0 / jnp.sqrt(512.0))
    b2 = jax.random.normal(k4, (1, 128), jnp.float32) * 0.01
    w3 = jax.random.normal(k5, (1, 128), jnp.float32) * (1.0 / jnp.sqrt(128.0))
    b3 = jax.random.normal(k6, (1, 1), jnp.float32) * 0.01
    return w1, b1, w2, b2, w3, b3


if __name__ == "__main__":
    key = jax.random.PRNGKey(0)
    kx, kx2, kp = jax.random.split(key, 3)
    params = init_params(kp)

    # --- small smoke test (single tile) ---
    B = 8
    x = jax.random.normal(kx, (B, 1024), jnp.float32)
    y = mlp_forward(x, *params)
    jax.block_until_ready(y)
    assert y.shape == (B,), y.shape
    y_ref = mlp_reference(x, *params)
    assert jnp.allclose(y, y_ref, atol=1e-2, rtol=1e-2), (
        f"max abs err {jnp.max(jnp.abs(y - y_ref))}")

    # --- multi-tile + partial last tile path (exercises cdiv grid) ---
    B2 = 200
    x2 = jax.random.normal(kx2, (B2, 1024), jnp.float32)
    y2 = mlp_forward(x2, *params, tile_m=128)   # 2 tiles, last one partial
    jax.block_until_ready(y2)
    assert y2.shape == (B2,), y2.shape
    y2_ref = mlp_reference(x2, *params)
    assert jnp.allclose(y2, y2_ref, atol=1e-2, rtol=1e-2), (
        f"max abs err {jnp.max(jnp.abs(y2 - y2_ref))}")

    print("KERNEL_OK")
</pallas_src>

<mosaic_0001>
module attributes {stable_mosaic.version = 11 : i64} {
  func.func @mlp_kernel(%arg0: i32, %arg1: memref<8x1024xf32, #tpu.memory_space<vmem>>, %arg2: memref<1024x512xbf16, #tpu.memory_space<vmem>>, %arg3: memref<1x512xf32, #tpu.memory_space<vmem>>, %arg4: memref<512x128xbf16, #tpu.memory_space<vmem>>, %arg5: memref<1x128xf32, #tpu.memory_space<vmem>>, %arg6: memref<1x128xbf16, #tpu.memory_space<vmem>>, %arg7: memref<1x1xf32, #tpu.memory_space<smem>>, %arg8: memref<1x8xf32, #tpu.memory_space<vmem>>) attributes {dimension_semantics = [#tpu.dimension_semantics<parallel>], iteration_bounds = array<i64: 1>, scalar_prefetch = 0 : i64, scratch_operands = 0 : i64, tpu.core_type = #tpu.core_type<tc>, window_params = [{transform_indices = @transform_0, window_bounds = array<i64: 8, 1024>}, {pipeline_mode = #tpu.pipeline_mode<synchronous>, transform_indices = @transform_1, window_bounds = array<i64: 1024, 512>}, {pipeline_mode = #tpu.pipeline_mode<synchronous>, transform_indices = @transform_2, window_bounds = array<i64: 1, 512>}, {pipeline_mode = #tpu.pipeline_mode<synchronous>, transform_indices = @transform_3, window_bounds = array<i64: 512, 128>}, {pipeline_mode = #tpu.pipeline_mode<synchronous>, transform_indices = @transform_4, window_bounds = array<i64: 1, 128>}, {pipeline_mode = #tpu.pipeline_mode<synchronous>, transform_indices = @transform_5, window_bounds = array<i64: 1, 128>}, {transform_indices = @transform_6, window_bounds = array<i64: 1, 1>}, {transform_indices = @transform_7, window_bounds = array<i64: 1, 8>}]} {
    %c0 = arith.constant 0 : index
    %c0_0 = arith.constant 0 : index
    %0 = vector.load %arg1[%c0, %c0_0] : memref<8x1024xf32, #tpu.memory_space<vmem>>, vector<8x1024xf32>
    %1 = arith.truncf %0 : vector<8x1024xf32> to vector<8x1024xbf16>
    %c0_1 = arith.constant 0 : index
    %c0_2 = arith.constant 0 : index
    %2 = vector.load %arg2[%c0_1, %c0_2] : memref<1024x512xbf16, #tpu.memory_space<vmem>>, vector<1024x512xbf16>
    %cst = arith.constant dense<0.000000e+00> : vector<8x512xf32>
    %3 = tpu.matmul %1, %2, %cst {dimension_numbers = #tpu.dot_dimension_numbers<[1], [0], [0], [1], [0, 0, 1, 1], [], []>} : vector<8x1024xbf16>, vector<1024x512xbf16>, vector<8x512xf32> -> vector<8x512xf32>
    %c0_3 = arith.constant 0 : index
    %c0_4 = arith.constant 0 : index
    %4 = vector.load %arg3[%c0_3, %c0_4] : memref<1x512xf32, #tpu.memory_space<vmem>>, vector<1x512xf32>
    %5 = vector.broadcast %4 : vector<1x512xf32> to vector<8x512xf32>
    %6 = arith.addf %3, %5 : vector<8x512xf32>
    %cst_5 = arith.constant 0.000000e+00 : f32
    %7 = vector.broadcast %cst_5 : f32 to vector<8x512xf32>
    %8 = arith.maximumf %6, %7 : vector<8x512xf32>
    %9 = arith.truncf %8 : vector<8x512xf32> to vector<8x512xbf16>
    %c0_6 = arith.constant 0 : index
    %c0_7 = arith.constant 0 : index
    %10 = vector.load %arg4[%c0_6, %c0_7] : memref<512x128xbf16, #tpu.memory_space<vmem>>, vector<512x128xbf16>
    %cst_8 = arith.constant dense<0.000000e+00> : vector<8x128xf32>
    %11 = tpu.matmul %9, %10, %cst_8 {dimension_numbers = #tpu.dot_dimension_numbers<[1], [0], [0], [1], [0, 0, 1, 1], [], []>} : vector<8x512xbf16>, vector<512x128xbf16>, vector<8x128xf32> -> vector<8x128xf32>
    %c0_9 = arith.constant 0 : index
    %c0_10 = arith.constant 0 : index
    %12 = vector.load %arg5[%c0_9, %c0_10] : memref<1x128xf32, #tpu.memory_space<vmem>>, vector<1x128xf32>
    %13 = vector.broadcast %12 : vector<1x128xf32> to vector<8x128xf32>
    %14 = arith.addf %11, %13 : vector<8x128xf32>
    %cst_11 = arith.constant 0.000000e+00 : f32
    %15 = vector.broadcast %cst_11 : f32 to vector<8x128xf32>
    %16 = arith.maximumf %14, %15 : vector<8x128xf32>
    %c0_12 = arith.constant 0 : index
    %c0_13 = arith.constant 0 : index
    %17 = vector.load %arg6[%c0_12, %c0_13] : memref<1x128xbf16, #tpu.memory_space<vmem>>, vector<1x128xbf16>
    %18 = arith.truncf %16 : vector<8x128xf32> to vector<8x128xbf16>
    %cst_14 = arith.constant dense<0.000000e+00> : vector<1x8xf32>
    %19 = tpu.matmul %17, %18, %cst_14 {dimension_numbers = #tpu.dot_dimension_numbers<[1], [1], [0], [0], [0, 0, 1, 0], [], []>} : vector<1x128xbf16>, vector<8x128xbf16>, vector<1x8xf32> -> vector<1x8xf32>
    %c0_15 = arith.constant 0 : index
    %c0_16 = arith.constant 0 : index
    %20 = memref.load %arg7[%c0_15, %c0_16] : memref<1x1xf32, #tpu.memory_space<smem>>
    %21 = vector.broadcast %20 : f32 to vector<1x8xf32>
    %22 = arith.addf %19, %21 : vector<1x8xf32>
    %c0_17 = arith.constant 0 : index
    %c0_18 = arith.constant 0 : index
    %23 = vector.load %arg8[%c0_17, %c0_18] : memref<1x8xf32, #tpu.memory_space<vmem>>, vector<1x8xf32>
    tpu.vector_store %arg8[%c0_17, %c0_18], %22 {strides = array<i32>} : memref<1x8xf32, #tpu.memory_space<vmem>>, vector<1x8xf32>,
    return
  }
  func.func @transform_0(%arg0: i32) -> (i32, i32) {
    %c0_i32 = arith.constant 0 : i32
    %c0_i32_0 = arith.constant 0 : i32
    return %arg0, %c0_i32 : i32, i32
  }
  func.func @transform_1(%arg0: i32) -> (i32, i32) {
    %c0_i32 = arith.constant 0 : i32
    %c0_i32_0 = arith.constant 0 : i32
    %c0_i32_1 = arith.constant 0 : i32
    return %c0_i32, %c0_i32_0 : i32, i32
  }
  func.func @transform_2(%arg0: i32) -> (i32, i32) {
    %c0_i32 = arith.constant 0 : i32
    %c0_i32_0 = arith.constant 0 : i32
    %c0_i32_1 = arith.constant 0 : i32
    return %c0_i32, %c0_i32_0 : i32, i32
  }
  func.func @transform_3(%arg0: i32) -> (i32, i32) {
    %c0_i32 = arith.constant 0 : i32
    %c0_i32_0 = arith.constant 0 : i32
    %c0_i32_1 = arith.constant 0 : i32
    return %c0_i32, %c0_i32_0 : i32, i32
  }
  func.func @transform_4(%arg0: i32) -> (i32, i32) {
    %c0_i32 = arith.constant 0 : i32
    %c0_i32_0 = arith.constant 0 : i32
    %c0_i32_1 = arith.constant 0 : i32
    return %c0_i32, %c0_i32_0 : i32, i32
  }
  func.func @transform_5(%arg0: i32) -> (i32, i32) {
    %c0_i32 = arith.constant 0 : i32
    %c0_i32_0 = arith.constant 0 : i32
    %c0_i32_1 = arith.constant 0 : i32
    return %c0_i32, %c0_i32_0 : i32, i32
  }
  func.func @transform_6(%arg0: i32) -> (i32, i32) {
    %c0_i32 = arith.constant 0 : i32
    %c0_i32_0 = arith.constant 0 : i32
    %c0_i32_1 = arith.constant 0 : i32
    return %c0_i32, %c0_i32_0 : i32, i32
  }
  func.func @transform_7(%arg0: i32) -> (i32, i32) {
    %c0_i32 = arith.constant 0 : i32
    %c0_i32_0 = arith.constant 0 : i32
    return %arg0, %c0_i32 : i32, i32
  }
}

</mosaic_0001>

<bundles_post_ra>
// kernel: tpu_custom_call.1
= control target key start
LH: loop header
LB: loop body
LE: loop exit
PB: predicated region body
PF: predicated region fallthrough
CT: control target
= control target key end

     0   :  { %13 = vsyncpa [#allocation4], 0  ;;  %s4148_s0 = inlined_call_operand.hbm [shape: f32[8,1024], index: 0, kind: input, shape index: {}]   ;;  %s4149_s1 = inlined_call_operand.hbm [shape: bf16[1024,512], index: 1, kind: input, shape index: {}]   ;;  %s4150_s2 = inlined_call_operand.hbm [shape: f32[1,512], index: 2, kind: input, shape index: {}]   ;;  %s4151_s3 = inlined_call_operand.hbm [shape: bf16[512,128], index: 3, kind: input, shape index: {}]   ;;  %s4152_s4 = inlined_call_operand.vmem [shape: f32[1,128], index: 4, kind: input, shape index: {}]   ;;  %s4153_s5 = inlined_call_operand.vmem [shape: bf16[1,128], index: 5, kind: input, shape index: {}]   ;;  %s4154_s6 = inlined_call_operand.<no memory space> [shape: f32[1,1], index: 6, kind: input, shape index: {}]   ;;  %s4155_s7 = inlined_call_operand.hbm [shape: f32[1,8], index: 7, kind: output, shape index: {}]  }
   0x1   :  { %14 = vsyncpa [#allocation7], 0 }
   0x2   :  { %15 = vsyncpa [#allocation10], 0  ;;  %s32_s26 = sshll.u32 %s4149_s1, 4  ;;  %s33_s26 = int_to_ptr.hbm [resolvable:$true] %s32_s26 }
   0x3   :  { %16 = vsyncpa [#allocation5], 0  ;;  %s4003_s27 = smov [#allocation6]   ;;  %s22_s8 = sshll.u32 %s4148_s0, 4  ;;  %s23_s8 = int_to_ptr.hbm [resolvable:$true] %s22_s8 }
   0x4   :  { %s34_s28 = sshll.u32 %s4003_s27, 4  ;;  %s4004_s9 = smov 256   ;;  %s35_s28 = int_to_ptr.vmem [resolvable:$true] %s34_s28 }
   0x5   :  { %s4005_s10 = smov 16   ;;  %s4006_s11 = smov [#allocation3]  }
   0x6   :  { %40 = dma.hbm_to_vmem [thread:$0]  %s33_s26, 32768, %s35_s28, [#allocation7], %s4004_s9, %s4004_s9, %s4005_s10  }
   0x7   :  { %s24_s12 = sshll.u32 %s4006_s11, 4  ;;  %s46_s15 = sshll.u32 %s4150_s2, 4  ;;  %s25_s12 = int_to_ptr.vmem [resolvable:$true] %s24_s12  ;;  %s47_s15 = int_to_ptr.hbm [resolvable:$true] %s46_s15 }
   0x8   :  { %27 = dma.hbm_to_vmem [thread:$0]  %s23_s8, 1024, %s25_s12, [#allocation4]  }
   0x9   :  { %s56_s17 = sshll.u32 %s4151_s3, 4  ;;  %s4007_s18 = smov [#allocation8]   ;;  %s57_s17 = int_to_ptr.hbm [resolvable:$true] %s56_s17 }
   0xa   :  { %s48_s19 = sshll.u32 %s4007_s18, 4  ;;  %s4008_s0 = smov [#allocation9]   ;;  %s49_s19 = int_to_ptr.vmem [resolvable:$true] %s48_s19 }
   0xb   :  { %51 = dma.hbm_to_vmem [thread:$0]  %s47_s15, 64, %s49_s19, [#allocation7]  }
   0xc   :  { %s58_s20 = sshll.u32 %s4008_s0, 4  ;;  %s4009_s21 = smov 64   ;;  %s59_s20 = int_to_ptr.vmem [resolvable:$true] %s58_s20 }
   0xd   :  { %s4010_s22 = smov 4  }
   0xe   :  { %64 = dma.hbm_to_vmem [thread:$0]  %s57_s17, 4096, %s59_s20, [#allocation10], %s4009_s21, %s4009_s21, %s4010_s22  }
   0xf   :  { %3995 = dma.done.wait [#allocation4], 1024  }
  0x10   :  { %3996 = vsyncadd [#allocation4], 4294966272 }
  0x11   :  { %3997 = dma.done.wait [#allocation7], 32832  }
  0x12   :  { %3998 = vsyncadd [#allocation7], 4294934464 }
  0x13   :  { %3999 = dma.done.wait [#allocation10], 4096  }
  0x14   :  { %4000 = vsyncadd [#allocation10], 4294963200  ;;  %v2539_v0 = vld [vmem:[#allocation6 + $0xe0] sm:$0xf]  ;;  %v3607_v1 = vld [vmem:[#allocation6 + $0xec] sm:$0xf0] }
  0x15   :  { %v2667_v2 = vld [vmem:[#allocation6 + $0x1e0] sm:$0xf]  ;;  %v2540_v3 = vor.u32 %v3607_v1, %v2539_v0  ;;  %v3639_v4 = vld [vmem:[#allocation6 + $0x1ec] sm:$0xf0]  ;;  %s4011_s26 = smov [#allocation11]   ;;  %s2413_s30 = sshll.u32 %s4155_s7, 4  ;;  %s2414_s30 = int_to_ptr.hbm [resolvable:$true] %s2413_s30 }
  0x16   :  { %v2795_v5 = vld [vmem:[#allocation6 + $0x2e0] sm:$0xf]  ;;  %v3671_v6 = vld [vmem:[#allocation6 + $0x2ec] sm:$0xf0]  ;;  %v2668_v7 = vor.u32 %v3639_v4, %v2667_v2  ;;  %s2411_s27 = sshll.u32 %s4011_s26, 4  ;;  %vm2404_vm0 = vcmask 57344   ;;  %s2412_s27 = int_to_ptr.vmem [resolvable:$true] %s2411_s27 }
  0x17   :  { %v2796_v8 = vor.u32 %v3671_v6, %v2795_v5  ;;  %v2923_v9 = vld [vmem:[#allocation6 + $0x3e0] sm:$0xf]  ;;  %v3703_v10 = vld [vmem:[#allocation6 + $0x3ec] sm:$0xf0]  ;;  %1650 = vmatpush.bf16.msra.mxu0 %v2540_v3 }
  0x18   :  { %v2523_v11 = vld [vmem:[#allocation6 + $0xc0] sm:$0xf]  ;;  %v2924_v12 = vor.u32 %v3703_v10, %v2923_v9  ;;  %v3603_v13 = vld [vmem:[#allocation6 + $0xcc] sm:$0xf0]  ;;  %1663 = vmatpush.bf16.msra.mxu1 %v2668_v7 }
  0x19   :  { %v2651_v14 = vld [vmem:[#allocation6 + $0x1c0] sm:$0xf]  ;;  %v3635_v15 = vld [vmem:[#allocation6 + $0x1cc] sm:$0xf0]  ;;  %1676 = vmatpush.bf16.msra.mxu2 %v2796_v8  ;;  %v2524_v16 = vor.u32 %v3603_v13, %v2523_v11 }
  0x1a   :  { %v2652_v17 = vor.u32 %v3635_v15, %v2651_v14  ;;  %v2779_v18 = vld [vmem:[#allocation6 + $0x2c0] sm:$0xf]  ;;  %v3667_v19 = vld [vmem:[#allocation6 + $0x2cc] sm:$0xf0]  ;;  %1689 = vmatpush.bf16.msra.mxu3 %v2924_v12 }
  0x1b   :  { %v2907_v20 = vld [vmem:[#allocation6 + $0x3c0] sm:$0xf]  ;;  %v2780_v21 = vor.u32 %v3667_v19, %v2779_v18  ;;  %v3699_v22 = vld [vmem:[#allocation6 + $0x3cc] sm:$0xf0]  ;;  %1651 = vmatpush.bf16.msra.mxu0 %v2524_v16 }
  0x1c   :  { %v2507_v23 = vld [vmem:[#allocation6 + $0xa0] sm:$0xf]  ;;  %v3599_v24 = vld [vmem:[#allocation6 + $0xac] sm:$0xf0]  ;;  %v2908_v25 = vor.u32 %v3699_v22, %v2907_v20  ;;  %1664 = vmatpush.bf16.msra.mxu1 %v2652_v17 }
  0x1d   :  { %v2635_v26 = vld [vmem:[#allocation6 + $0x1a0] sm:$0xf]  ;;  %v3631_v27 = vld [vmem:[#allocation6 + $0x1ac] sm:$0xf0]  ;;  %v2508_v29 = vor.u32 %v3599_v24, %v2507_v23  ;;  %1677 = vmatpush.bf16.msra.mxu2 %v2780_v21 }
  0x1e   :  { %v2763_v28 = vld [vmem:[#allocation6 + $0x2a0] sm:$0xf]  ;;  %v3663_v30 = vld [vmem:[#allocation6 + $0x2ac] sm:$0xf0]  ;;  %v2636_v33 = vor.u32 %v3631_v27, %v2635_v26  ;;  %1690 = vmatpush.bf16.msra.mxu3 %v2908_v25 }
  0x1f   :  { %v2891_v31 = vld [vmem:[#allocation6 + $0x3a0] sm:$0xf]  ;;  %v3695_v32 = vld [vmem:[#allocation6 + $0x3ac] sm:$0xf0]  ;;  %v2764_v34 = vor.u32 %v3663_v30, %v2763_v28  ;;  %1652 = vmatpush.bf16.msra.mxu0 %v2508_v29 }
  0x20   :  { %v2491_v35 = vld [vmem:[#allocation6 + $0x80] sm:$0xf]  ;;  %v3595_v36 = vld [vmem:[#allocation6 + $0x8c] sm:$0xf0]  ;;  %v2892_v38 = vor.u32 %v3695_v32, %v2891_v31  ;;  %1665 = vmatpush.bf16.msra.mxu1 %v2636_v33 }
  0x21   :  { %v2619_v37 = vld [vmem:[#allocation6 + $0x180] sm:$0xf]  ;;  %v3627_v39 = vld [vmem:[#allocation6 + $0x18c] sm:$0xf0]  ;;  %v2492_v44 = vor.u32 %v3595_v36, %v2491_v35  ;;  %1678 = vmatpush.bf16.msra.mxu2 %v2764_v34 }
  0x22   :  { %v2747_v40 = vld [vmem:[#allocation6 + $0x280] sm:$0xf]  ;;  %v3659_v41 = vld [vmem:[#allocation6 + $0x28c] sm:$0xf0]  ;;  %v2620_v45 = vor.u32 %v3627_v39, %v2619_v37  ;;  %1691 = vmatpush.bf16.msra.mxu3 %v2892_v38 }
  0x23   :  { %v2875_v42 = vld [vmem:[#allocation6 + $0x380] sm:$0xf]  ;;  %v3691_v43 = vld [vmem:[#allocation6 + $0x38c] sm:$0xf0]  ;;  %v2748_v46 = vor.u32 %v3659_v41, %v2747_v40  ;;  %1653 = vmatpush.bf16.msra.mxu0 %v2492_v44 }
  0x24   :  { %v2475_v47 = vld [vmem:[#allocation6 + $0x60] sm:$0xf]  ;;  %v3591_v48 = vld [vmem:[#allocation6 + $0x6c] sm:$0xf0]  ;;  %v2876_v50 = vor.u32 %v3691_v43, %v2875_v42  ;;  %1666 = vmatpush.bf16.msra.mxu1 %v2620_v45 }
  0x25   :  { %v2603_v49 = vld [vmem:[#allocation6 + $0x160] sm:$0xf]  ;;  %v3623_v51 = vld [vmem:[#allocation6 + $0x16c] sm:$0xf0]  ;;  %v2476_v56 = vor.u32 %v3591_v48, %v2475_v47  ;;  %1679 = vmatpush.bf16.msra.mxu2 %v2748_v46 }
  0x26   :  { %v2731_v52 = vld [vmem:[#allocation6 + $0x260] sm:$0xf]  ;;  %v3655_v53 = vld [vmem:[#allocation6 + $0x26c] sm:$0xf0]  ;;  %v2604_v57 = vor.u32 %v3623_v51, %v2603_v49  ;;  %1692 = vmatpush.bf16.msra.mxu3 %v2876_v50 }
  0x27   :  { %v2859_v54 = vld [vmem:[#allocation6 + $0x360] sm:$0xf]  ;;  %v3687_v55 = vld [vmem:[#allocation6 + $0x36c] sm:$0xf0]  ;;  %v2732_v58 = vor.u32 %v3655_v53, %v2731_v52  ;;  %1654 = vmatpush.bf16.msra.mxu0 %v2476_v56 }
  0x28   :  { %v2459_v59 = vld [vmem:[#allocation6 + $0x40] sm:$0xf]  ;;  %v3587_v60 = vld [vmem:[#allocation6 + $0x4c] sm:$0xf0]  ;;  %v2860_v62 = vor.u32 %v3687_v55, %v2859_v54  ;;  %1667 = vmatpush.bf16.msra.mxu1 %v2604_v57 }
  0x29   :  { %v2587_v61 = vld [vmem:[#allocation6 + $0x140] sm:$0xf]  ;;  %v3619_v63 = vld [vmem:[#allocation6 + $0x14c] sm:$0xf0]  ;;  %v2460_v4 = vor.u32 %v3587_v60, %v2459_v59  ;;  %1680 = vmatpush.bf16.msra.mxu2 %v2732_v58 }
  0x2a   :  { %v2715_v0 = vld [vmem:[#allocation6 + $0x240] sm:$0xf]  ;;  %v3651_v1 = vld [vmem:[#allocation6 + $0x24c] sm:$0xf0]  ;;  %v2588_v5 = vor.u32 %v3619_v63, %v2587_v61  ;;  %1693 = vmatpush.bf16.msra.mxu3 %v2860_v62 }
  0x2b   :  { %v2843_v2 = vld [vmem:[#allocation6 + $0x340] sm:$0xf]  ;;  %v3683_v3 = vld [vmem:[#allocation6 + $0x34c] sm:$0xf0]  ;;  %v2716_v6 = vor.u32 %v3651_v1, %v2715_v0  ;;  %1655 = vmatpush.bf16.msra.mxu0 %v2460_v4 }
  0x2c   :  { %v2443_v7 = vld [vmem:[#allocation6 + $0x20] sm:$0xf]  ;;  %v3583_v8 = vld [vmem:[#allocation6 + $0x2c] sm:$0xf0]  ;;  %v2844_v10 = vor.u32 %v3683_v3, %v2843_v2  ;;  %1668 = vmatpush.bf16.msra.mxu1 %v2588_v5 }
  0x2d   :  { %v2571_v9 = vld [vmem:[#allocation6 + $0x120] sm:$0xf]  ;;  %v3615_v11 = vld [vmem:[#allocation6 + $0x12c] sm:$0xf0]  ;;  %v2444_v16 = vor.u32 %v3583_v8, %v2443_v7  ;;  %1681 = vmatpush.bf16.msra.mxu2 %v2716_v6 }
  0x2e   :  { %v2699_v12 = vld [vmem:[#allocation6 + $0x220] sm:$0xf]  ;;  %v3647_v13 = vld [vmem:[#allocation6 + $0x22c] sm:$0xf0]  ;;  %v2572_v19 = vor.u32 %v3615_v11, %v2571_v9  ;;  %1694 = vmatpush.bf16.msra.mxu3 %v2844_v10  ;;  %v91_v10 = vld [vmem:[#allocation3 + $0x18] sm:$0xff] }
  0x2f   :  { %v2827_v14 = vld [vmem:[#allocation6 + $0x320] sm:$0xf]  ;;  %v3679_v15 = vld [vmem:[#allocation6 + $0x32c] sm:$0xf0]  ;;  %v2700_v20 = vor.u32 %v3647_v13, %v2699_v12  ;;  %1656 = vmatpush.bf16.msra.mxu0 %v2444_v16 }
  0x30   :  { %v2427_v17 = vld [vmem:[#allocation6] sm:$0xf]  ;;  %v3579_v18 = vld [vmem:[#allocation6 + $0xc] sm:$0xf0]  ;;  %v2828_v24 = vor.u32 %v3679_v15, %v2827_v14  ;;  %1669 = vmatpush.bf16.msra.mxu1 %v2572_v19  ;;  %v4068_v15 = vpack.c.bf16 %v91_v10, %v91_v10  ;;  %v89_v19 = vld [vmem:[#allocation3 + $0x8] sm:$0xff] }
  0x31   :  { %v2555_v21 = vld [vmem:[#allocation6 + $0x100] sm:$0xf]  ;;  %v3611_v22 = vld [vmem:[#allocation6 + $0x10c] sm:$0xf0]  ;;  %v2428_v31 = vor.u32 %v3579_v18, %v2427_v17  ;;  %1682 = vmatpush.bf16.msra.mxu2 %v2700_v20  ;;  %v2669_v10 = vld [vmem:[#allocation6 + $0x1f0] sm:$0xf0] }
  0x32   :  { %v2683_v23 = vld [vmem:[#allocation6 + $0x200] sm:$0xf]  ;;  %v3643_v25 = vld [vmem:[#allocation6 + $0x20c] sm:$0xf0]  ;;  %v2556_v35 = vor.u32 %v3611_v22, %v2555_v21  ;;  %1695 = vmatpush.bf16.msra.mxu3 %v2828_v24 }
  0x33   :  { %v2811_v26 = vld [vmem:[#allocation6 + $0x300] sm:$0xf]  ;;  %v3675_v27 = vld [vmem:[#allocation6 + $0x30c] sm:$0xf0]  ;;  %v2684_v36 = vor.u32 %v3643_v25, %v2683_v23  ;;  %1657 = vmatpush.bf16.msra.mxu0 %v2428_v31  ;;  %v4073_v25 = vpack.c.bf16 %v89_v19, %v89_v19 }
  0x34   :  { %v3051_v28 = vld [vmem:[#allocation6 + $0x4e0] sm:$0xf]  ;;  %v3735_v29 = vld [vmem:[#allocation6 + $0x4ec] sm:$0xf0]  ;;  %v2812_v39 = vor.u32 %v3675_v27, %v2811_v26  ;;  %1670 = vmatpush.bf16.msra.mxu1 %v2556_v35 }
  0x35   :  { %v3179_v30 = vld [vmem:[#allocation6 + $0x5e0] sm:$0xf]  ;;  %v3767_v32 = vld [vmem:[#allocation6 + $0x5ec] sm:$0xf0]  ;;  %v3052_v40 = vor.u32 %v3735_v29, %v3051_v28  ;;  %1683 = vmatpush.bf16.msra.mxu2 %v2684_v36 }
  0x36   :  { %v3307_v33 = vld [vmem:[#allocation6 + $0x6e0] sm:$0xf]  ;;  %v3799_v34 = vld [vmem:[#allocation6 + $0x6ec] sm:$0xf0]  ;;  %v3180_v41 = vor.u32 %v3767_v32, %v3179_v30  ;;  %1696 = vmatpush.bf16.msra.mxu3 %v2812_v39 }
  0x37   :  { %v3435_v37 = vld [vmem:[#allocation6 + $0x7e0] sm:$0xf]  ;;  %v3831_v38 = vld [vmem:[#allocation6 + $0x7ec] sm:$0xf0]  ;;  %v3308_v42 = vor.u32 %v3799_v34, %v3307_v33  ;;  %1702 = vmatpush.bf16.msrb.mxu0 %v3052_v40  ;;  %1671 = vmatmul.bf16.vlgmr.msra.gmra.mxu1 %v4073_v25 }
  0x38   :  { %v3035_v43 = vld [vmem:[#allocation6 + $0x4c0] sm:$0xf]  ;;  %v3731_v44 = vld [vmem:[#allocation6 + $0x4cc] sm:$0xf0]  ;;  %v3436_v46 = vor.u32 %v3831_v38, %v3435_v37  ;;  %1715 = vmatpush.bf16.msrb.mxu1 %v3180_v41 }
  0x39   :  { %v3163_v45 = vld [vmem:[#allocation6 + $0x5c0] sm:$0xf]  ;;  %v3763_v47 = vld [vmem:[#allocation6 + $0x5cc] sm:$0xf0]  ;;  %v3036_v52 = vor.u32 %v3731_v44, %v3035_v43  ;;  %1728 = vmatpush.bf16.msrb.mxu2 %v3308_v42  ;;  %1697 = vmatmul.bf16.vlgmr.msra.gmra.mxu3 %v4068_v15 }
  0x3a   :  { %v3291_v48 = vld [vmem:[#allocation6 + $0x6c0] sm:$0xf]  ;;  %v3795_v49 = vld [vmem:[#allocation6 + $0x6cc] sm:$0xf0]  ;;  %v3164_v54 = vor.u32 %v3763_v47, %v3163_v45  ;;  %1741 = vmatpush.bf16.msrb.mxu3 %v3436_v46 }
  0x3b   :  { %v3419_v50 = vld [vmem:[#allocation6 + $0x7c0] sm:$0xf]  ;;  %v3827_v51 = vld [vmem:[#allocation6 + $0x7cc] sm:$0xf0]  ;;  %v3292_v55 = vor.u32 %v3795_v49, %v3291_v48  ;;  %1703 = vmatpush.bf16.msrb.mxu0 %v3036_v52 }
  0x3c   :  { %v3019_v53 = vld [vmem:[#allocation6 + $0x4a0] sm:$0xf]  ;;  %v3727_v56 = vld [vmem:[#allocation6 + $0x4ac] sm:$0xf0]  ;;  %v3420_v59 = vor.u32 %v3827_v51, %v3419_v50  ;;  %1716 = vmatpush.bf16.msrb.mxu1 %v3164_v54 }
  0x3d   :  { %v3147_v57 = vld [vmem:[#allocation6 + $0x5a0] sm:$0xf]  ;;  %v3759_v58 = vld [vmem:[#allocation6 + $0x5ac] sm:$0xf0]  ;;  %v3020_v0 = vor.u32 %v3727_v56, %v3019_v53  ;;  %1729 = vmatpush.bf16.msrb.mxu2 %v3292_v55 }
  0x3e   :  { %v3275_v60 = vld [vmem:[#allocation6 + $0x6a0] sm:$0xf]  ;;  %v3791_v61 = vld [vmem:[#allocation6 + $0x6ac] sm:$0xf0]  ;;  %v3148_v1 = vor.u32 %v3759_v58, %v3147_v57  ;;  %1742 = vmatpush.bf16.msrb.mxu3 %v3420_v59 }
  0x3f   :  { %v3403_v62 = vld [vmem:[#allocation6 + $0x7a0] sm:$0xf]  ;;  %v3823_v63 = vld [vmem:[#allocation6 + $0x7ac] sm:$0xf0]  ;;  %v3276_v5 = vor.u32 %v3791_v61, %v3275_v60  ;;  %1704 = vmatpush.bf16.msrb.mxu0 %v3020_v0 }
  0x40   :  { %v3003_v2 = vld [vmem:[#allocation6 + $0x480] sm:$0xf]  ;;  %v90_v3 = vld [vmem:[#allocation3 + $0x10] sm:$0xff]  ;;  %v3404_v11 = vor.u32 %v3823_v63, %v3403_v62  ;;  %1717 = vmatpush.bf16.msrb.mxu1 %v3148_v1 }
  0x41   :  { %v88_v4 = vld [vmem:[#allocation3] sm:$0xff]  ;;  %v3723_v6 = vld [vmem:[#allocation6 + $0x48c] sm:$0xf0]  ;;  %v4064_v8 = vpack.c.bf16 %v90_v3, %v90_v3  ;;  %1730 = vmatpush.bf16.msrb.mxu2 %v3276_v5  ;;  %v2541_v5 = vld [vmem:[#allocation6 + $0xf0] sm:$0xf0] }
  0x42   :  { %v3131_v7 = vld [vmem:[#allocation6 + $0x580] sm:$0xf]  ;;  %v4066_v9 = vpack.c.bf16 %v88_v4, %v88_v4  ;;  %v3755_v12 = vld [vmem:[#allocation6 + $0x58c] sm:$0xf0]  ;;  %v3004_v18 = vor.u32 %v3723_v6, %v3003_v2  ;;  %1743 = vmatpush.bf16.msrb.mxu3 %v3404_v11  ;;  %v3605_v4 = vld [vmem:[#allocation6 + $0xe4] sm:$0xf] }
  0x43   :  { %v3259_v13 = vld [vmem:[#allocation6 + $0x680] sm:$0xf]  ;;  %v3787_v14 = vld [vmem:[#allocation6 + $0x68c] sm:$0xf0]  ;;  %1684 = vmatmul.bf16.vlgmr.msra.gmra.mxu2 %v4064_v8  ;;  %v3132_v20 = vor.u32 %v3755_v12, %v3131_v7  ;;  %v3637_v6 = vld [vmem:[#allocation6 + $0x1e4] sm:$0xf] }
  0x44   :  { %v3387_v16 = vld [vmem:[#allocation6 + $0x780] sm:$0xf]  ;;  %v3819_v17 = vld [vmem:[#allocation6 + $0x78c] sm:$0xf0]  ;;  %1658 = vmatmul.bf16.vlgmr.msra.gmra.mxu0 %v4066_v9  ;;  %v3260_v21 = vor.u32 %v3787_v14, %v3259_v13  ;;  %v3669_v11 = vld [vmem:[#allocation6 + $0x2e4] sm:$0xf] }
  0x45   :  { %v2987_v22 = vld [vmem:[#allocation6 + $0x460] sm:$0xf]  ;;  %v3719_v23 = vld [vmem:[#allocation6 + $0x46c] sm:$0xf0]  ;;  %v3388_v26 = vor.u32 %v3819_v17, %v3387_v16  ;;  %1705 = vmatpush.bf16.msrb.mxu0 %v3004_v18  ;;  %1718 = vmatpush.bf16.msrb.mxu1 %v3132_v20  ;;  %v2797_v12 = vld [vmem:[#allocation6 + $0x2f0] sm:$0xf0]  ;;  %v2544_v20 = vor.u32 %v3605_v4, %v2541_v5 }
  0x46   :  { %v3115_v24 = vld [vmem:[#allocation6 + $0x560] sm:$0xf]  ;;  %v3751_v27 = vld [vmem:[#allocation6 + $0x56c] sm:$0xf0]  ;;  %v2988_v32 = vor.u32 %v3719_v23, %v2987_v22  ;;  %1731 = vmatpush.bf16.msrb.mxu2 %v3260_v21  ;;  %v3701_v16 = vld [vmem:[#allocation6 + $0x3e4] sm:$0xf] }
  0x47   :  { %v3243_v28 = vld [vmem:[#allocation6 + $0x660] sm:$0xf]  ;;  %v3783_v29 = vld [vmem:[#allocation6 + $0x66c] sm:$0xf0]  ;;  %v3116_v33 = vor.u32 %v3751_v27, %v3115_v24  ;;  %1744 = vmatpush.bf16.msrb.mxu3 %v3388_v26  ;;  %v2925_v17 = vld [vmem:[#allocation6 + $0x3f0] sm:$0xf0]  ;;  %v2672_v24 = vor.u32 %v3637_v6, %v2669_v10  ;;  %v2800_v26 = vor.u32 %v3669_v11, %v2797_v12 }
  0x48   :  { %v3371_v30 = vld [vmem:[#allocation6 + $0x760] sm:$0xf]  ;;  %v3815_v31 = vld [vmem:[#allocation6 + $0x76c] sm:$0xf0]  ;;  %v3244_v34 = vor.u32 %v3783_v29, %v3243_v28  ;;  %v3601_v21 = vld [vmem:[#allocation6 + $0xc4] sm:$0xf] }
  0x49   :  { %v2971_v35 = vld [vmem:[#allocation6 + $0x440] sm:$0xf]  ;;  %v3715_v36 = vld [vmem:[#allocation6 + $0x44c] sm:$0xf0]  ;;  %v3372_v38 = vor.u32 %v3815_v31, %v3371_v30  ;;  %1706 = vmatpush.bf16.msrb.mxu0 %v2988_v32  ;;  %1719 = vmatpush.bf16.msrb.mxu1 %v3116_v33  ;;  %v95_v23 = vld [vmem:[#allocation3 + $0x38] sm:$0xff]  ;;  %v2928_v30 = vor.u32 %v3701_v16, %v2925_v17 }
  0x4a   :  { %v3099_v37 = vld [vmem:[#allocation6 + $0x540] sm:$0xf]  ;;  %v3747_v39 = vld [vmem:[#allocation6 + $0x54c] sm:$0xf0]  ;;  %v2972_v44 = vor.u32 %v3715_v36, %v2971_v35  ;;  %1732 = vmatpush.bf16.msrb.mxu2 %v3244_v34  ;;  %v2525_v27 = vld [vmem:[#allocation6 + $0xd0] sm:$0xf0] }
  0x4b   :  { %v3227_v40 = vld [vmem:[#allocation6 + $0x640] sm:$0xf]  ;;  %v3779_v41 = vld [vmem:[#allocation6 + $0x64c] sm:$0xf0]  ;;  %v3100_v45 = vor.u32 %v3747_v39, %v3099_v37  ;;  %1745 = vmatpush.bf16.msrb.mxu3 %v3372_v38  ;;  %v3633_v28 = vld [vmem:[#allocation6 + $0x1c4] sm:$0xf]  ;;  %v4080_v38 = vpack.c.bf16 %v95_v23, %v95_v23  ;;  %v2528_v39 = vor.u32 %v3601_v21, %v2525_v27 }
  0x4c   :  { %v3355_v42 = vld [vmem:[#allocation6 + $0x740] sm:$0xf]  ;;  %v3811_v43 = vld [vmem:[#allocation6 + $0x74c] sm:$0xf0]  ;;  %v3228_v46 = vor.u32 %v3779_v41, %v3227_v40  ;;  %v93_v29 = vld [vmem:[#allocation3 + $0x28] sm:$0xff] }
  0x4d   :  { %v2955_v47 = vld [vmem:[#allocation6 + $0x420] sm:$0xf]  ;;  %v3711_v48 = vld [vmem:[#allocation6 + $0x42c] sm:$0xf0]  ;;  %v3356_v50 = vor.u32 %v3811_v43, %v3355_v42  ;;  %1707 = vmatpush.bf16.msrb.mxu0 %v2972_v44  ;;  %1720 = vmatpush.bf16.msrb.mxu1 %v3100_v45  ;;  %v2653_v31 = vld [vmem:[#allocation6 + $0x1d0] sm:$0xf0]  ;;  %v4082_v40 = vpack.c.bf16 %v93_v29, %v93_v29 }
  0x4e   :  { %v3083_v49 = vld [vmem:[#allocation6 + $0x520] sm:$0xf]  ;;  %v3743_v51 = vld [vmem:[#allocation6 + $0x52c] sm:$0xf0]  ;;  %v2956_v56 = vor.u32 %v3711_v48, %v2955_v47  ;;  %1733 = vmatpush.bf16.msrb.mxu2 %v3228_v46  ;;  %v3665_v32 = vld [vmem:[#allocation6 + $0x2c4] sm:$0xf]  ;;  %v2656_v41 = vor.u32 %v3633_v28, %v2653_v31 }
  0x4f   :  { %v3211_v52 = vld [vmem:[#allocation6 + $0x620] sm:$0xf]  ;;  %v3775_v53 = vld [vmem:[#allocation6 + $0x62c] sm:$0xf0]  ;;  %v3084_v59 = vor.u32 %v3743_v51, %v3083_v49  ;;  %1746 = vmatpush.bf16.msrb.mxu3 %v3356_v50  ;;  %v2781_v33 = vld [vmem:[#allocation6 + $0x2d0] sm:$0xf0] }
  0x50   :  { %v3339_v54 = vld [vmem:[#allocation6 + $0x720] sm:$0xf]  ;;  %v3807_v55 = vld [vmem:[#allocation6 + $0x72c] sm:$0xf0]  ;;  %v3212_v60 = vor.u32 %v3775_v53, %v3211_v52  ;;  %v3697_v35 = vld [vmem:[#allocation6 + $0x3c4] sm:$0xf]  ;;  %v2784_v42 = vor.u32 %v3665_v32, %v2781_v33 }
  0x51   :  { %v2939_v57 = vld [vmem:[#allocation6 + $0x400] sm:$0xf]  ;;  %v3707_v58 = vld [vmem:[#allocation6 + $0x40c] sm:$0xf0]  ;;  %v3340_v0 = vor.u32 %v3807_v55, %v3339_v54  ;;  %1708 = vmatpush.bf16.msrb.mxu0 %v2956_v56  ;;  %1721 = vmatpush.bf16.msrb.mxu1 %v3084_v59  ;;  %v2909_v36 = vld [vmem:[#allocation6 + $0x3d0] sm:$0xf0] }
  0x52   :  { %v3067_v61 = vld [vmem:[#allocation6 + $0x500] sm:$0xf]  ;;  %v3739_v62 = vld [vmem:[#allocation6 + $0x50c] sm:$0xf0]  ;;  %v2940_v7 = vor.u32 %v3707_v58, %v2939_v57  ;;  %1734 = vmatpush.bf16.msrb.mxu2 %v3212_v60  ;;  %v3597_v43 = vld [vmem:[#allocation6 + $0xa4] sm:$0xf]  ;;  %v2912_v46 = vor.u32 %v3697_v35, %v2909_v36 }
  0x53   :  { %v3195_v63 = vld [vmem:[#allocation6 + $0x600] sm:$0xf]  ;;  %v3771_v1 = vld [vmem:[#allocation6 + $0x60c] sm:$0xf0]  ;;  %v3068_v13 = vor.u32 %v3739_v62, %v3067_v61  ;;  %1747 = vmatpush.bf16.msrb.mxu3 %v3340_v0  ;;  %v2509_v44 = vld [vmem:[#allocation6 + $0xb0] sm:$0xf0] }
  0x54   :  { %v3323_v2 = vld [vmem:[#allocation6 + $0x700] sm:$0xf]  ;;  %v3803_v3 = vld [vmem:[#allocation6 + $0x70c] sm:$0xf0]  ;;  %v3196_v14 = vor.u32 %v3771_v1, %v3195_v63  ;;  %v3629_v45 = vld [vmem:[#allocation6 + $0x1a4] sm:$0xf]  ;;  %v2512_v52 = vor.u32 %v3597_v43, %v2509_v44 }
  0x55   :  { %v94_v18 = vld [vmem:[#allocation3 + $0x30] sm:$0xff]  ;;  %v3324_v19 = vor.u32 %v3803_v3, %v3323_v2  ;;  %v92_v22 = vld [vmem:[#allocation3 + $0x20] sm:$0xff]  ;;  %1709 = vmatpush.bf16.msrb.mxu0 %v2940_v7  ;;  %1722 = vmatpush.bf16.msrb.mxu1 %v3068_v13 }
  0x56   :  { %v4076_v34 = vpack.c.bf16 %v94_v18, %v94_v18  ;;  %1735 = vmatpush.bf16.msrb.mxu2 %v3196_v14  ;;  %v4078_v37 = vpack.c.bf16 %v92_v22, %v92_v22  ;;  %v2637_v47 = vld [vmem:[#allocation6 + $0x1b0] sm:$0xf0]  ;;  %v3661_v48 = vld [vmem:[#allocation6 + $0x2a4] sm:$0xf] }
  0x57   :  { %1748 = vmatpush.bf16.msrb.mxu3 %v3324_v19  ;;  %v2765_v49 = vld [vmem:[#allocation6 + $0x2b0] sm:$0xf0]  ;;  %v3693_v50 = vld [vmem:[#allocation6 + $0x3a4] sm:$0xf]  ;;  %v2640_v53 = vor.u32 %v3629_v45, %v2637_v47 }
  0x58   :  { %v2893_v51 = vld [vmem:[#allocation6 + $0x3b0] sm:$0xf0]  ;;  %1710 = vmatmul.bf16.vlgmr.msrb.gmra.mxu0 %v4078_v37  ;;  %1723 = vmatmul.bf16.vlgmr.msrb.gmra.mxu1 %v4082_v40  ;;  %v2768_v54 = vor.u32 %v3661_v48, %v2765_v49  ;;  %v3593_v55 = vld [vmem:[#allocation6 + $0x84] sm:$0xf] }
  0x59   :  { %1754 = vmatpush.bf16.msra.mxu0 %v2544_v20  ;;  %1767 = vmatpush.bf16.msra.mxu1 %v2672_v24  ;;  %v2493_v56 = vld [vmem:[#allocation6 + $0x90] sm:$0xf0]  ;;  %v3625_v57 = vld [vmem:[#allocation6 + $0x184] sm:$0xf]  ;;  %v2896_v58 = vor.u32 %v3693_v50, %v2893_v51 }
  0x5a   :  { %1780 = vmatpush.bf16.msra.mxu2 %v2800_v26  ;;  %1749 = vmatmul.bf16.vlgmr.msrb.gmra.mxu3 %v4080_v38  ;;  %v2621_v59 = vld [vmem:[#allocation6 + $0x190] sm:$0xf0]  ;;  %v3657_v60 = vld [vmem:[#allocation6 + $0x284] sm:$0xf]  ;;  %v2496_v0 = vor.u32 %v3593_v55, %v2493_v56 }
  0x5b   :  { %1793 = vmatpush.bf16.msra.mxu3 %v2928_v30  ;;  %1736 = vmatmul.bf16.vlgmr.msrb.gmra.mxu2 %v4076_v34  ;;  %v2749_v61 = vld [vmem:[#allocation6 + $0x290] sm:$0xf0]  ;;  %v3689_v62 = vld [vmem:[#allocation6 + $0x384] sm:$0xf]  ;;  %v2624_v1 = vor.u32 %v3625_v57, %v2621_v59 }
  0x5c   :  { %v2877_v63 = vld [vmem:[#allocation6 + $0x390] sm:$0xf0]  ;;  %v2752_v2 = vor.u32 %v3657_v60, %v2749_v61  ;;  %v3589_v3 = vld [vmem:[#allocation6 + $0x64] sm:$0xf] }
  0x5d   :  { %1755 = vmatpush.bf16.msra.mxu0 %v2528_v39  ;;  %1768 = vmatpush.bf16.msra.mxu1 %v2656_v41  ;;  %v2477_v4 = vld [vmem:[#allocation6 + $0x70] sm:$0xf0]  ;;  %v3621_v5 = vld [vmem:[#allocation6 + $0x164] sm:$0xf]  ;;  %v2880_v6 = vor.u32 %v3689_v62, %v2877_v63 }
  0x5e   :  { %1781 = vmatpush.bf16.msra.mxu2 %v2784_v42  ;;  %v2605_v7 = vld [vmem:[#allocation6 + $0x170] sm:$0xf0]  ;;  %v3653_v10 = vld [vmem:[#allocation6 + $0x264] sm:$0xf]  ;;  %v2480_v14 = vor.u32 %v3589_v3, %v2477_v4 }
  0x5f   :  { %1794 = vmatpush.bf16.msra.mxu3 %v2912_v46  ;;  %v2733_v11 = vld [vmem:[#allocation6 + $0x270] sm:$0xf0]  ;;  %v3685_v12 = vld [vmem:[#allocation6 + $0x364] sm:$0xf]  ;;  %v2608_v16 = vor.u32 %v3621_v5, %v2605_v7 }
  0x60   :  { %v2861_v13 = vld [vmem:[#allocation6 + $0x370] sm:$0xf0]  ;;  %v2736_v17 = vor.u32 %v3653_v10, %v2733_v11  ;;  %v3585_v18 = vld [vmem:[#allocation6 + $0x44] sm:$0xf] }
  0x61   :  { %1756 = vmatpush.bf16.msra.mxu0 %v2512_v52  ;;  %1769 = vmatpush.bf16.msra.mxu1 %v2640_v53  ;;  %v2461_v19 = vld [vmem:[#allocation6 + $0x50] sm:$0xf0]  ;;  %v3617_v20 = vld [vmem:[#allocation6 + $0x144] sm:$0xf]  ;;  %v2864_v21 = vor.u32 %v3685_v12, %v2861_v13 }
  0x62   :  { %1782 = vmatpush.bf16.msra.mxu2 %v2768_v54  ;;  %v2589_v22 = vld [vmem:[#allocation6 + $0x150] sm:$0xf0]  ;;  %v3649_v23 = vld [vmem:[#allocation6 + $0x244] sm:$0xf]  ;;  %v2464_v28 = vor.u32 %v3585_v18, %v2461_v19 }
  0x63   :  { %1795 = vmatpush.bf16.msra.mxu3 %v2896_v58  ;;  %v2717_v24 = vld [vmem:[#allocation6 + $0x250] sm:$0xf0]  ;;  %v3681_v26 = vld [vmem:[#allocation6 + $0x344] sm:$0xf]  ;;  %v2592_v29 = vor.u32 %v3617_v20, %v2589_v22 }
  0x64   :  { %v2845_v27 = vld [vmem:[#allocation6 + $0x350] sm:$0xf0]  ;;  %v2720_v30 = vor.u32 %v3649_v23, %v2717_v24  ;;  %v3581_v31 = vld [vmem:[#allocation6 + $0x24] sm:$0xf] }
  0x65   :  { %1757 = vmatpush.bf16.msra.mxu0 %v2496_v0  ;;  %1770 = vmatpush.bf16.msra.mxu1 %v2624_v1  ;;  %v2445_v32 = vld [vmem:[#allocation6 + $0x30] sm:$0xf0]  ;;  %v3613_v33 = vld [vmem:[#allocation6 + $0x124] sm:$0xf]  ;;  %v2848_v35 = vor.u32 %v3681_v26, %v2845_v27 }
  0x66   :  { %1783 = vmatpush.bf16.msra.mxu2 %v2752_v2  ;;  %v2573_v36 = vld [vmem:[#allocation6 + $0x130] sm:$0xf0]  ;;  %v3645_v39 = vld [vmem:[#allocation6 + $0x224] sm:$0xf]  ;;  %v2448_v44 = vor.u32 %v3581_v31, %v2445_v32 }
  0x67   :  { %1796 = vmatpush.bf16.msra.mxu3 %v2880_v6  ;;  %v2701_v41 = vld [vmem:[#allocation6 + $0x230] sm:$0xf0]  ;;  %v3677_v42 = vld [vmem:[#allocation6 + $0x324] sm:$0xf]  ;;  %v2576_v47 = vor.u32 %v3613_v33, %v2573_v36 }
  0x68   :  { %v2829_v43 = vld [vmem:[#allocation6 + $0x330] sm:$0xf0]  ;;  %v3577_v45 = vld [vmem:[#allocation6 + $0x4] sm:$0xf]  ;;  %v2704_v48 = vor.u32 %v3645_v39, %v2701_v41 }
  0x69   :  { %1758 = vmatpush.bf16.msra.mxu0 %v2480_v14  ;;  %1771 = vmatpush.bf16.msra.mxu1 %v2608_v16  ;;  %v2429_v46 = vld [vmem:[#allocation6 + $0x10] sm:$0xf0]  ;;  %v3609_v49 = vld [vmem:[#allocation6 + $0x104] sm:$0xf]  ;;  %v2832_v52 = vor.u32 %v3677_v42, %v2829_v43 }
  0x6a   :  { %1784 = vmatpush.bf16.msra.mxu2 %v2736_v17  ;;  %v2557_v50 = vld [vmem:[#allocation6 + $0x110] sm:$0xf0]  ;;  %v3641_v51 = vld [vmem:[#allocation6 + $0x204] sm:$0xf]  ;;  %v2432_v59 = vor.u32 %v3577_v45, %v2429_v46 }
  0x6b   :  { %1797 = vmatpush.bf16.msra.mxu3 %v2864_v21  ;;  %v2685_v53 = vld [vmem:[#allocation6 + $0x210] sm:$0xf0]  ;;  %v3673_v54 = vld [vmem:[#allocation6 + $0x304] sm:$0xf]  ;;  %v2560_v63 = vor.u32 %v3609_v49, %v2557_v50 }
  0x6c   :  { %v2813_v55 = vld [vmem:[#allocation6 + $0x310] sm:$0xf0]  ;;  %v3733_v56 = vld [vmem:[#allocation6 + $0x4e4] sm:$0xf]  ;;  %v2688_v0 = vor.u32 %v3641_v51, %v2685_v53 }
  0x6d   :  { %1759 = vmatpush.bf16.msra.mxu0 %v2464_v28  ;;  %1772 = vmatpush.bf16.msra.mxu1 %v2592_v29  ;;  %v3053_v57 = vld [vmem:[#allocation6 + $0x4f0] sm:$0xf0]  ;;  %v3765_v58 = vld [vmem:[#allocation6 + $0x5e4] sm:$0xf]  ;;  %v2816_v3 = vor.u32 %v3673_v54, %v2813_v55 }
  0x6e   :  { %1785 = vmatpush.bf16.msra.mxu2 %v2720_v30  ;;  %v3181_v60 = vld [vmem:[#allocation6 + $0x5f0] sm:$0xf0]  ;;  %v3797_v61 = vld [vmem:[#allocation6 + $0x6e4] sm:$0xf]  ;;  %v3056_v4 = vor.u32 %v3733_v56, %v3053_v57 }
  0x6f   :  { %1798 = vmatpush.bf16.msra.mxu3 %v2848_v35  ;;  %v3309_v62 = vld [vmem:[#allocation6 + $0x6f0] sm:$0xf0]  ;;  %v3829_v1 = vld [vmem:[#allocation6 + $0x7e4] sm:$0xf]  ;;  %v3184_v5 = vor.u32 %v3765_v58, %v3181_v60 }
  0x70   :  { %v3437_v2 = vld [vmem:[#allocation6 + $0x7f0] sm:$0xf0]  ;;  %v3312_v6 = vor.u32 %v3797_v61, %v3309_v62  ;;  %v3729_v7 = vld [vmem:[#allocation6 + $0x4c4] sm:$0xf] }
  0x71   :  { %1760 = vmatpush.bf16.msra.mxu0 %v2448_v44  ;;  %1773 = vmatpush.bf16.msra.mxu1 %v2576_v47  ;;  %v3037_v10 = vld [vmem:[#allocation6 + $0x4d0] sm:$0xf0]  ;;  %v3761_v11 = vld [vmem:[#allocation6 + $0x5c4] sm:$0xf]  ;;  %v3440_v12 = vor.u32 %v3829_v1, %v3437_v2 }
  0x72   :  { %1786 = vmatpush.bf16.msra.mxu2 %v2704_v48  ;;  %v3165_v13 = vld [vmem:[#allocation6 + $0x5d0] sm:$0xf0]  ;;  %v3793_v14 = vld [vmem:[#allocation6 + $0x6c4] sm:$0xf]  ;;  %v3040_v19 = vor.u32 %v3729_v7, %v3037_v10 }
  0x73   :  { %1799 = vmatpush.bf16.msra.mxu3 %v2832_v52  ;;  %v3293_v16 = vld [vmem:[#allocation6 + $0x6d0] sm:$0xf0]  ;;  %v3825_v17 = vld [vmem:[#allocation6 + $0x7c4] sm:$0xf]  ;;  %v3168_v20 = vor.u32 %v3761_v11, %v3165_v13 }
  0x74   :  { %v3421_v18 = vld [vmem:[#allocation6 + $0x7d0] sm:$0xf0]  ;;  %v3296_v21 = vor.u32 %v3793_v14, %v3293_v16  ;;  %v3725_v22 = vld [vmem:[#allocation6 + $0x4a4] sm:$0xf] }
  0x75   :  { %1761 = vmatpush.bf16.msra.mxu0 %v2432_v59  ;;  %1774 = vmatpush.bf16.msra.mxu1 %v2560_v63  ;;  %v3021_v23 = vld [vmem:[#allocation6 + $0x4b0] sm:$0xf0]  ;;  %v3757_v24 = vld [vmem:[#allocation6 + $0x5a4] sm:$0xf]  ;;  %v3424_v26 = vor.u32 %v3825_v17, %v3421_v18 }
  0x76   :  { %1787 = vmatpush.bf16.msra.mxu2 %v2688_v0  ;;  %v3149_v27 = vld [vmem:[#allocation6 + $0x5b0] sm:$0xf0]  ;;  %v3789_v28 = vld [vmem:[#allocation6 + $0x6a4] sm:$0xf]  ;;  %v3024_v32 = vor.u32 %v3725_v22, %v3021_v23 }
  0x77   :  { %1800 = vmatpush.bf16.msra.mxu3 %v2816_v3  ;;  %v3277_v29 = vld [vmem:[#allocation6 + $0x6b0] sm:$0xf0]  ;;  %v3821_v30 = vld [vmem:[#allocation6 + $0x7a4] sm:$0xf]  ;;  %v3152_v33 = vor.u32 %v3757_v24, %v3149_v27 }
  0x78   :  { %v3405_v31 = vld [vmem:[#allocation6 + $0x7b0] sm:$0xf0]  ;;  %1762 = vmatmul.bf16.vlgmr.msra.gmra.mxu0 %v4066_v9  ;;  %1775 = vmatmul.bf16.vlgmr.msra.gmra.mxu1 %v4073_v25  ;;  %v3280_v35 = vor.u32 %v3789_v28, %v3277_v29  ;;  %v3721_v36 = vld [vmem:[#allocation6 + $0x484] sm:$0xf] }
  0x79   :  { %1806 = vmatpush.bf16.msrb.mxu0 %v3056_v4  ;;  %1819 = vmatpush.bf16.msrb.mxu1 %v3184_v5  ;;  %v3005_v39 = vld [vmem:[#allocation6 + $0x490] sm:$0xf0]  ;;  %v3753_v41 = vld [vmem:[#allocation6 + $0x584] sm:$0xf]  ;;  %v3408_v42 = vor.u32 %v3821_v30, %v3405_v31 }
  0x7a   :  { %1832 = vmatpush.bf16.msrb.mxu2 %v3312_v6  ;;  %1801 = vmatmul.bf16.vlgmr.msra.gmra.mxu3 %v4068_v15  ;;  %v3133_v43 = vld [vmem:[#allocation6 + $0x590] sm:$0xf0]  ;;  %v3785_v44 = vld [vmem:[#allocation6 + $0x684] sm:$0xf]  ;;  %v3008_v48 = vor.u32 %v3721_v36, %v3005_v39  ;;  %v2547_v39 = vld [vmem:[#allocation6 + $0xe8] sm:$0xf] }
  0x7b   :  { %1845 = vmatpush.bf16.msrb.mxu3 %v3440_v12  ;;  %1788 = vmatmul.bf16.vlgmr.msra.gmra.mxu2 %v4064_v8  ;;  %v3261_v45 = vld [vmem:[#allocation6 + $0x690] sm:$0xf0]  ;;  %v3817_v46 = vld [vmem:[#allocation6 + $0x784] sm:$0xf]  ;;  %v3136_v49 = vor.u32 %v3753_v41, %v3133_v43  ;;  %v3608_v41 = vld [vmem:[#allocation6 + $0xf4] sm:$0xf0] }
  0x7c   :  { %v3389_v47 = vld [vmem:[#allocation6 + $0x790] sm:$0xf0]  ;;  %v3264_v50 = vor.u32 %v3785_v44, %v3261_v45  ;;  %v3717_v51 = vld [vmem:[#allocation6 + $0x464] sm:$0xf]  ;;  %v3640_v44 = vld [vmem:[#allocation6 + $0x1f4] sm:$0xf0] }
  0x7d   :  { %1807 = vmatpush.bf16.msrb.mxu0 %v3040_v19  ;;  %1820 = vmatpush.bf16.msrb.mxu1 %v3168_v20  ;;  %v2989_v52 = vld [vmem:[#allocation6 + $0x470] sm:$0xf0]  ;;  %v3749_v53 = vld [vmem:[#allocation6 + $0x564] sm:$0xf]  ;;  %v3392_v54 = vor.u32 %v3817_v46, %v3389_v47  ;;  %v2803_v45 = vld [vmem:[#allocation6 + $0x2e8] sm:$0xf] }
  0x7e   :  { %1833 = vmatpush.bf16.msrb.mxu2 %v3296_v21  ;;  %v3117_v55 = vld [vmem:[#allocation6 + $0x570] sm:$0xf0]  ;;  %v3781_v56 = vld [vmem:[#allocation6 + $0x664] sm:$0xf]  ;;  %v2992_v60 = vor.u32 %v3717_v51, %v2989_v52  ;;  %v3672_v46 = vld [vmem:[#allocation6 + $0x2f4] sm:$0xf0]  ;;  %v2548_v52 = vor.u32 %v3608_v41, %v2547_v39 }
  0x7f   :  { %1846 = vmatpush.bf16.msrb.mxu3 %v3424_v26  ;;  %v3245_v57 = vld [vmem:[#allocation6 + $0x670] sm:$0xf0]  ;;  %v3813_v58 = vld [vmem:[#allocation6 + $0x764] sm:$0xf]  ;;  %v3120_v61 = vor.u32 %v3749_v53, %v3117_v55  ;;  %v2531_v55 = vld [vmem:[#allocation6 + $0xc8] sm:$0xf] }
  0x80   :  { %v3373_v59 = vld [vmem:[#allocation6 + $0x770] sm:$0xf0]  ;;  %v3248_v62 = vor.u32 %v3781_v56, %v3245_v57  ;;  %v3713_v63 = vld [vmem:[#allocation6 + $0x444] sm:$0xf]  ;;  %v3604_v56 = vld [vmem:[#allocation6 + $0xd4] sm:$0xf0] }
  0x81   :  { %1808 = vmatpush.bf16.msrb.mxu0 %v3024_v32  ;;  %1821 = vmatpush.bf16.msrb.mxu1 %v3152_v33  ;;  %v2973_v0 = vld [vmem:[#allocation6 + $0x450] sm:$0xf0]  ;;  %v3745_v1 = vld [vmem:[#allocation6 + $0x544] sm:$0xf]  ;;  %v3376_v2 = vor.u32 %v3813_v58, %v3373_v59  ;;  %v2659_v57 = vld [vmem:[#allocation6 + $0x1c8] sm:$0xf] }
  0x82   :  { %1834 = vmatpush.bf16.msrb.mxu2 %v3280_v35  ;;  %v3101_v3 = vld [vmem:[#allocation6 + $0x550] sm:$0xf0]  ;;  %v3777_v4 = vld [vmem:[#allocation6 + $0x644] sm:$0xf]  ;;  %v2976_v10 = vor.u32 %v3713_v63, %v2973_v0  ;;  %v3636_v59 = vld [vmem:[#allocation6 + $0x1d4] sm:$0xf0]  ;;  %v2532_v0 = vor.u32 %v3604_v56, %v2531_v55 }
  0x83   :  { %1847 = vmatpush.bf16.msrb.mxu3 %v3408_v42  ;;  %v3229_v5 = vld [vmem:[#allocation6 + $0x650] sm:$0xf0]  ;;  %v3809_v6 = vld [vmem:[#allocation6 + $0x744] sm:$0xf]  ;;  %v3104_v11 = vor.u32 %v3745_v1, %v3101_v3  ;;  %v2675_v42 = vld [vmem:[#allocation6 + $0x1e8] sm:$0xf]  ;;  %v2660_v1 = vor.u32 %v3636_v59, %v2659_v57 }
  0x84   :  { %v3357_v7 = vld [vmem:[#allocation6 + $0x750] sm:$0xf0]  ;;  %v3232_v12 = vor.u32 %v3777_v4, %v3229_v5  ;;  %v3709_v13 = vld [vmem:[#allocation6 + $0x424] sm:$0xf]  ;;  %v2676_v53 = vor.u32 %v3640_v44, %v2675_v42  ;;  %v3700_v63 = vld [vmem:[#allocation6 + $0x3d4] sm:$0xf0] }
  0x85   :  { %1809 = vmatpush.bf16.msrb.mxu0 %v3008_v48  ;;  %1822 = vmatpush.bf16.msrb.mxu1 %v3136_v49  ;;  %v2957_v14 = vld [vmem:[#allocation6 + $0x430] sm:$0xf0]  ;;  %v3741_v16 = vld [vmem:[#allocation6 + $0x524] sm:$0xf]  ;;  %v3360_v17 = vor.u32 %v3809_v6, %v3357_v7  ;;  %v2931_v49 = vld [vmem:[#allocation6 + $0x3e8] sm:$0xf] }
  0x86   :  { %1835 = vmatpush.bf16.msrb.mxu2 %v3264_v50  ;;  %v3085_v18 = vld [vmem:[#allocation6 + $0x530] sm:$0xf0]  ;;  %v3773_v19 = vld [vmem:[#allocation6 + $0x624] sm:$0xf]  ;;  %v2960_v23 = vor.u32 %v3709_v13, %v2957_v14  ;;  %v3704_v50 = vld [vmem:[#allocation6 + $0x3f4] sm:$0xf0] }
  0x87   :  { %1848 = vmatpush.bf16.msrb.mxu3 %v3392_v54  ;;  %v3213_v20 = vld [vmem:[#allocation6 + $0x630] sm:$0xf0]  ;;  %v3805_v21 = vld [vmem:[#allocation6 + $0x724] sm:$0xf]  ;;  %v3088_v27 = vor.u32 %v3741_v16, %v3085_v18  ;;  %v2804_v54 = vor.u32 %v3672_v46, %v2803_v45  ;;  %v2932_v58 = vor.u32 %v3704_v50, %v2931_v49  ;;  %v2515_v3 = vld [vmem:[#allocation6 + $0xa8] sm:$0xf] }
  0x88   :  { %v3341_v22 = vld [vmem:[#allocation6 + $0x730] sm:$0xf0]  ;;  %v3705_v24 = vld [vmem:[#allocation6 + $0x404] sm:$0xf]  ;;  %v3216_v28 = vor.u32 %v3773_v19, %v3213_v20  ;;  %v3600_v4 = vld [vmem:[#allocation6 + $0xb4] sm:$0xf0] }
  0x89   :  { %1810 = vmatpush.bf16.msrb.mxu0 %v2992_v60  ;;  %1823 = vmatpush.bf16.msrb.mxu1 %v3120_v61  ;;  %v2941_v26 = vld [vmem:[#allocation6 + $0x410] sm:$0xf0]  ;;  %v3737_v29 = vld [vmem:[#allocation6 + $0x504] sm:$0xf]  ;;  %v3344_v32 = vor.u32 %v3805_v21, %v3341_v22  ;;  %v2787_v60 = vld [vmem:[#allocation6 + $0x2c8] sm:$0xf]  ;;  %v2516_v14 = vor.u32 %v3600_v4, %v2515_v3 }
  0x8a   :  { %1836 = vmatpush.bf16.msrb.mxu2 %v3248_v62  ;;  %v3069_v30 = vld [vmem:[#allocation6 + $0x510] sm:$0xf0]  ;;  %v3769_v31 = vld [vmem:[#allocation6 + $0x604] sm:$0xf]  ;;  %v2944_v43 = vor.u32 %v3705_v24, %v2941_v26  ;;  %v3668_v61 = vld [vmem:[#allocation6 + $0x2d4] sm:$0xf0] }
  0x8b   :  { %1849 = vmatpush.bf16.msrb.mxu3 %v3376_v2  ;;  %v3197_v33 = vld [vmem:[#allocation6 + $0x610] sm:$0xf0]  ;;  %v3801_v35 = vld [vmem:[#allocation6 + $0x704] sm:$0xf]  ;;  %v3072_v47 = vor.u32 %v3737_v29, %v3069_v30  ;;  %v2915_v62 = vld [vmem:[#allocation6 + $0x3c8] sm:$0xf]  ;;  %v2788_v2 = vor.u32 %v3668_v61, %v2787_v60 }
  0x8c   :  { %v3325_v36 = vld [vmem:[#allocation6 + $0x710] sm:$0xf0]  ;;  %v3200_v48 = vor.u32 %v3769_v31, %v3197_v33  ;;  %v2643_v5 = vld [vmem:[#allocation6 + $0x1a8] sm:$0xf]  ;;  %v2916_v6 = vor.u32 %v3700_v63, %v2915_v62  ;;  %v3632_v7 = vld [vmem:[#allocation6 + $0x1b4] sm:$0xf0] }
  0x8d   :  { %1811 = vmatpush.bf16.msrb.mxu0 %v2976_v10  ;;  %1824 = vmatpush.bf16.msrb.mxu1 %v3104_v11  ;;  %v3328_v51 = vor.u32 %v3801_v35, %v3325_v36  ;;  %v2771_v10 = vld [vmem:[#allocation6 + $0x2a8] sm:$0xf]  ;;  %v3664_v11 = vld [vmem:[#allocation6 + $0x2b4] sm:$0xf0]  ;;  %v2644_v16 = vor.u32 %v3632_v7, %v2643_v5 }
  0x8e   :  { %1837 = vmatpush.bf16.msrb.mxu2 %v3232_v12  ;;  %v2899_v12 = vld [vmem:[#allocation6 + $0x3a8] sm:$0xf]  ;;  %v3696_v13 = vld [vmem:[#allocation6 + $0x3b4] sm:$0xf0] }
  0x8f   :  { %1850 = vmatpush.bf16.msrb.mxu3 %v3360_v17  ;;  %v2772_v17 = vor.u32 %v3664_v11, %v2771_v10  ;;  %v2499_v18 = vld [vmem:[#allocation6 + $0x88] sm:$0xf]  ;;  %v3596_v19 = vld [vmem:[#allocation6 + $0x94] sm:$0xf0]  ;;  %v2900_v21 = vor.u32 %v3696_v13, %v2899_v12 }
  0x90   :  { %v2627_v20 = vld [vmem:[#allocation6 + $0x188] sm:$0xf]  ;;  %v3628_v22 = vld [vmem:[#allocation6 + $0x194] sm:$0xf0] }
  0x91   :  { %1812 = vmatpush.bf16.msrb.mxu0 %v2960_v23  ;;  %1825 = vmatpush.bf16.msrb.mxu1 %v3088_v27  ;;  %v2755_v23 = vld [vmem:[#allocation6 + $0x288] sm:$0xf]  ;;  %v3660_v24 = vld [vmem:[#allocation6 + $0x294] sm:$0xf0]  ;;  %v2628_v29 = vor.u32 %v3628_v22, %v2627_v20 }
  0x92   :  { %1838 = vmatpush.bf16.msrb.mxu2 %v3216_v28  ;;  %v2883_v26 = vld [vmem:[#allocation6 + $0x388] sm:$0xf]  ;;  %v3692_v27 = vld [vmem:[#allocation6 + $0x394] sm:$0xf0]  ;;  %v2500_v28 = vor.u32 %v3596_v19, %v2499_v18  ;;  %v2756_v30 = vor.u32 %v3660_v24, %v2755_v23 }
  0x93   :  { %1851 = vmatpush.bf16.msrb.mxu3 %v3344_v32  ;;  %v2483_v31 = vld [vmem:[#allocation6 + $0x68] sm:$0xf]  ;;  %v3592_v32 = vld [vmem:[#allocation6 + $0x74] sm:$0xf0]  ;;  %v2884_v35 = vor.u32 %v3692_v27, %v2883_v26 }
  0x94   :  { %v2611_v33 = vld [vmem:[#allocation6 + $0x168] sm:$0xf]  ;;  %v3624_v36 = vld [vmem:[#allocation6 + $0x174] sm:$0xf0]  ;;  %v2484_v44 = vor.u32 %v3592_v32, %v2483_v31 }
  0x95   :  { %1813 = vmatpush.bf16.msrb.mxu0 %v2944_v43  ;;  %1826 = vmatpush.bf16.msrb.mxu1 %v3072_v47  ;;  %v2739_v39 = vld [vmem:[#allocation6 + $0x268] sm:$0xf]  ;;  %v3656_v41 = vld [vmem:[#allocation6 + $0x274] sm:$0xf0]  ;;  %v2612_v45 = vor.u32 %v3624_v36, %v2611_v33 }
  0x96   :  { %1839 = vmatpush.bf16.msrb.mxu2 %v3200_v48  ;;  %v2867_v42 = vld [vmem:[#allocation6 + $0x368] sm:$0xf]  ;;  %v3688_v43 = vld [vmem:[#allocation6 + $0x374] sm:$0xf0]  ;;  %v2740_v46 = vor.u32 %v3656_v41, %v2739_v39 }
  0x97   :  { %1852 = vmatpush.bf16.msrb.mxu3 %v3328_v51  ;;  %v2467_v47 = vld [vmem:[#allocation6 + $0x48] sm:$0xf]  ;;  %v3588_v48 = vld [vmem:[#allocation6 + $0x54] sm:$0xf0]  ;;  %v2868_v50 = vor.u32 %v3688_v43, %v2867_v42 }
  0x98   :  { %1814 = vmatmul.bf16.vlgmr.msrb.gmra.mxu0 %v4078_v37  ;;  %1827 = vmatmul.bf16.vlgmr.msrb.gmra.mxu1 %v4082_v40  ;;  %v2595_v49 = vld [vmem:[#allocation6 + $0x148] sm:$0xf]  ;;  %v3620_v51 = vld [vmem:[#allocation6 + $0x154] sm:$0xf0]  ;;  %v2468_v56 = vor.u32 %v3588_v48, %v2467_v47 }
  0x99   :  { %1858 = vmatpush.bf16.msra.mxu0 %v2548_v52  ;;  %1871 = vmatpush.bf16.msra.mxu1 %v2676_v53  ;;  %v2723_v52 = vld [vmem:[#allocation6 + $0x248] sm:$0xf]  ;;  %v3652_v53 = vld [vmem:[#allocation6 + $0x254] sm:$0xf0]  ;;  %v2596_v57 = vor.u32 %v3620_v51, %v2595_v49 }
  0x9a   :  { %1884 = vmatpush.bf16.msra.mxu2 %v2804_v54  ;;  %1853 = vmatmul.bf16.vlgmr.msrb.gmra.mxu3 %v4080_v38  ;;  %v2851_v54 = vld [vmem:[#allocation6 + $0x348] sm:$0xf]  ;;  %v3684_v55 = vld [vmem:[#allocation6 + $0x354] sm:$0xf0] }
  0x9b   :  { %1897 = vmatpush.bf16.msra.mxu3 %v2932_v58  ;;  %1840 = vmatmul.bf16.vlgmr.msrb.gmra.mxu2 %v4076_v34  ;;  %v2724_v58 = vor.u32 %v3652_v53, %v2723_v52  ;;  %v2451_v59 = vld [vmem:[#allocation6 + $0x28] sm:$0xf]  ;;  %v3584_v60 = vld [vmem:[#allocation6 + $0x34] sm:$0xf0]  ;;  %v2852_v62 = vor.u32 %v3684_v55, %v2851_v54 }
  0x9c   :  { %v2579_v61 = vld [vmem:[#allocation6 + $0x128] sm:$0xf]  ;;  %v3616_v63 = vld [vmem:[#allocation6 + $0x134] sm:$0xf0]  ;;  %v2452_v4 = vor.u32 %v3584_v60, %v2451_v59 }
  0x9d   :  { %1859 = vmatpush.bf16.msra.mxu0 %v2532_v0  ;;  %1872 = vmatpush.bf16.msra.mxu1 %v2660_v1  ;;  %v2707_v0 = vld [vmem:[#allocation6 + $0x228] sm:$0xf]  ;;  %v3648_v1 = vld [vmem:[#allocation6 + $0x234] sm:$0xf0]  ;;  %v2580_v7 = vor.u32 %v3616_v63, %v2579_v61 }
  0x9e   :  { %1885 = vmatpush.bf16.msra.mxu2 %v2788_v2  ;;  %v2835_v2 = vld [vmem:[#allocation6 + $0x328] sm:$0xf]  ;;  %v3680_v3 = vld [vmem:[#allocation6 + $0x334] sm:$0xf0]  ;;  %v2708_v10 = vor.u32 %v3648_v1, %v2707_v0 }
  0x9f   :  { %1898 = vmatpush.bf16.msra.mxu3 %v2916_v6  ;;  %v2435_v5 = vld [vmem:[#allocation6 + $0x8] sm:$0xf]  ;;  %v3580_v6 = vld [vmem:[#allocation6 + $0x14] sm:$0xf0] }
  0xa0   :  { %v2563_v11 = vld [vmem:[#allocation6 + $0x108] sm:$0xf]  ;;  %v3612_v12 = vld [vmem:[#allocation6 + $0x114] sm:$0xf0]  ;;  %v2436_v22 = vor.u32 %v3580_v6, %v2435_v5  ;;  %v4100_v6 = vld [vmem:[#allocation8] sm:$0xf] }
  0xa1   :  { %1860 = vmatpush.bf16.msra.mxu0 %v2516_v14  ;;  %1873 = vmatpush.bf16.msra.mxu1 %v2644_v16  ;;  %v2691_v13 = vld [vmem:[#allocation6 + $0x208] sm:$0xf]  ;;  %v2836_v14 = vor.u32 %v3680_v3, %v2835_v2  ;;  %v3644_v16 = vld [vmem:[#allocation6 + $0x214] sm:$0xf0]  ;;  %v2564_v27 = vor.u32 %v3612_v12, %v2563_v11 }
  0xa2   :  { %1886 = vmatpush.bf16.msra.mxu2 %v2772_v17  ;;  %v2819_v17 = vld [vmem:[#allocation6 + $0x308] sm:$0xf]  ;;  %v3676_v18 = vld [vmem:[#allocation6 + $0x314] sm:$0xf0] }
  0xa3   :  { %1899 = vmatpush.bf16.msra.mxu3 %v2900_v21  ;;  %v3059_v19 = vld [vmem:[#allocation6 + $0x4e8] sm:$0xf]  ;;  %v3736_v20 = vld [vmem:[#allocation6 + $0x4f4] sm:$0xf0]  ;;  %v2820_v31 = vor.u32 %v3676_v18, %v2819_v17  ;;  %v362_v18 = vperm.slane %v4100_v6, 0 }
  0xa4   :  { %v3187_v21 = vld [vmem:[#allocation6 + $0x5e8] sm:$0xf]  ;;  %v3768_v23 = vld [vmem:[#allocation6 + $0x5f4] sm:$0xf0]  ;;  %v3060_v32 = vor.u32 %v3736_v20, %v3059_v19 }
  0xa5   :  { %1861 = vmatpush.bf16.msra.mxu0 %v2500_v28  ;;  %1874 = vmatpush.bf16.msra.mxu1 %v2628_v29  ;;  %v3315_v24 = vld [vmem:[#allocation6 + $0x6e8] sm:$0xf]  ;;  %v3800_v26 = vld [vmem:[#allocation6 + $0x6f4] sm:$0xf0]  ;;  %v2692_v28 = vor.u32 %v3644_v16, %v2691_v13  ;;  %v3188_v33 = vor.u32 %v3768_v23, %v3187_v21 }
  0xa6   :  { %1887 = vmatpush.bf16.msra.mxu2 %v2756_v30  ;;  %v3443_v29 = vld [vmem:[#allocation6 + $0x7e8] sm:$0xf]  ;;  %v3832_v30 = vld [vmem:[#allocation6 + $0x7f4] sm:$0xf0] }
  0xa7   :  { %1900 = vmatpush.bf16.msra.mxu3 %v2884_v35  ;;  %v3316_v35 = vor.u32 %v3800_v26, %v3315_v24  ;;  %v3043_v36 = vld [vmem:[#allocation6 + $0x4c8] sm:$0xf]  ;;  %v3732_v39 = vld [vmem:[#allocation6 + $0x4d4] sm:$0xf0]  ;;  %v3444_v42 = vor.u32 %v3832_v30, %v3443_v29 }
  0xa8   :  { %v3171_v41 = vld [vmem:[#allocation6 + $0x5c8] sm:$0xf]  ;;  %v3764_v43 = vld [vmem:[#allocation6 + $0x5d4] sm:$0xf0]  ;;  %v3044_v48 = vor.u32 %v3732_v39, %v3043_v36 }
  0xa9   :  { %1862 = vmatpush.bf16.msra.mxu0 %v2484_v44  ;;  %1875 = vmatpush.bf16.msra.mxu1 %v2612_v45  ;;  %v3299_v44 = vld [vmem:[#allocation6 + $0x6c8] sm:$0xf]  ;;  %v3796_v45 = vld [vmem:[#allocation6 + $0x6d4] sm:$0xf0]  ;;  %v3172_v49 = vor.u32 %v3764_v43, %v3171_v41 }
  0xaa   :  { %1888 = vmatpush.bf16.msra.mxu2 %v2740_v46  ;;  %v3427_v46 = vld [vmem:[#allocation6 + $0x7c8] sm:$0xf]  ;;  %v3828_v47 = vld [vmem:[#allocation6 + $0x7d4] sm:$0xf0] }
  0xab   :  { %1901 = vmatpush.bf16.msra.mxu3 %v2868_v50  ;;  %v3300_v50 = vor.u32 %v3796_v45, %v3299_v44  ;;  %v3027_v51 = vld [vmem:[#allocation6 + $0x4a8] sm:$0xf]  ;;  %v3728_v52 = vld [vmem:[#allocation6 + $0x4b4] sm:$0xf0]  ;;  %v3428_v54 = vor.u32 %v3828_v47, %v3427_v46 }
  0xac   :  { %v3155_v53 = vld [vmem:[#allocation6 + $0x5a8] sm:$0xf]  ;;  %v3760_v55 = vld [vmem:[#allocation6 + $0x5b4] sm:$0xf0]  ;;  %v3028_v60 = vor.u32 %v3728_v52, %v3027_v51 }
  0xad   :  { %1863 = vmatpush.bf16.msra.mxu0 %v2468_v56  ;;  %1876 = vmatpush.bf16.msra.mxu1 %v2596_v57  ;;  %v3283_v56 = vld [vmem:[#allocation6 + $0x6a8] sm:$0xf]  ;;  %v3792_v57 = vld [vmem:[#allocation6 + $0x6b4] sm:$0xf0] }
  0xae   :  { %1889 = vmatpush.bf16.msra.mxu2 %v2724_v58  ;;  %v3411_v58 = vld [vmem:[#allocation6 + $0x7a8] sm:$0xf]  ;;  %v3824_v59 = vld [vmem:[#allocation6 + $0x7b4] sm:$0xf0]  ;;  %v3284_v63 = vor.u32 %v3792_v57, %v3283_v56 }
  0xaf   :  { %1902 = vmatpush.bf16.msra.mxu3 %v2852_v62  ;;  %v3011_v61 = vld [vmem:[#allocation6 + $0x488] sm:$0xf]  ;;  %v3156_v62 = vor.u32 %v3760_v55, %v3155_v53  ;;  %v3724_v0 = vld [vmem:[#allocation6 + $0x494] sm:$0xf0]  ;;  %v3412_v3 = vor.u32 %v3824_v59, %v3411_v58 }
  0xb0   :  { %v3139_v1 = vld [vmem:[#allocation6 + $0x588] sm:$0xf]  ;;  %v3756_v2 = vld [vmem:[#allocation6 + $0x594] sm:$0xf0]  ;;  %v3012_v11 = vor.u32 %v3724_v0, %v3011_v61 }
  0xb1   :  { %1864 = vmatpush.bf16.msra.mxu0 %v2452_v4  ;;  %1877 = vmatpush.bf16.msra.mxu1 %v2580_v7  ;;  %v3267_v4 = vld [vmem:[#allocation6 + $0x688] sm:$0xf]  ;;  %v3788_v5 = vld [vmem:[#allocation6 + $0x694] sm:$0xf0]  ;;  %v3140_v13 = vor.u32 %v3756_v2, %v3139_v1 }
  0xb2   :  { %1890 = vmatpush.bf16.msra.mxu2 %v2708_v10  ;;  %v3395_v7 = vld [vmem:[#allocation6 + $0x788] sm:$0xf]  ;;  %v3820_v10 = vld [vmem:[#allocation6 + $0x794] sm:$0xf0] }
  0xb3   :  { %1903 = vmatpush.bf16.msra.mxu3 %v2836_v14  ;;  %v2995_v12 = vld [vmem:[#allocation6 + $0x468] sm:$0xf]  ;;  %v3268_v14 = vor.u32 %v3788_v5, %v3267_v4  ;;  %v3720_v16 = vld [vmem:[#allocation6 + $0x474] sm:$0xf0]  ;;  %v3396_v19 = vor.u32 %v3820_v10, %v3395_v7 }
  0xb4   :  { %v3123_v17 = vld [vmem:[#allocation6 + $0x568] sm:$0xf]  ;;  %v3752_v20 = vld [vmem:[#allocation6 + $0x574] sm:$0xf0]  ;;  %v2996_v26 = vor.u32 %v3720_v16, %v2995_v12  ;;  %v1672_v45 = vpop.f32.mrf.mxu1  ;;  %v2549_v16 = vld [vmem:[#allocation6 + $0xf8] sm:$0xf0] }
  0xb5   :  { %1865 = vmatpush.bf16.msra.mxu0 %v2436_v22  ;;  %1878 = vmatpush.bf16.msra.mxu1 %v2564_v27  ;;  %v3251_v21 = vld [vmem:[#allocation6 + $0x668] sm:$0xf]  ;;  %v3784_v22 = vld [vmem:[#allocation6 + $0x674] sm:$0xf0] }
  0xb6   :  { %1891 = vmatpush.bf16.msra.mxu2 %v2692_v28  ;;  %v3379_v23 = vld [vmem:[#allocation6 + $0x768] sm:$0xf]  ;;  %v3816_v24 = vld [vmem:[#allocation6 + $0x774] sm:$0xf0]  ;;  %v3124_v28 = vor.u32 %v3752_v20, %v3123_v17  ;;  %v3252_v29 = vor.u32 %v3784_v22, %v3251_v21  ;;  %v3638_v17 = vld [vmem:[#allocation6 + $0x1ec] sm:$0xf] }
  0xb7   :  { %1904 = vmatpush.bf16.msra.mxu3 %v2820_v31  ;;  %v2979_v30 = vld [vmem:[#allocation6 + $0x448] sm:$0xf]  ;;  %v3716_v31 = vld [vmem:[#allocation6 + $0x454] sm:$0xf0]  ;;  %v3670_v20 = vld [vmem:[#allocation6 + $0x2ec] sm:$0xf] }
  0xb8   :  { %1866 = vmatmul.bf16.vlgmr.msra.gmra.mxu0 %v4066_v9  ;;  %1879 = vmatmul.bf16.vlgmr.msra.gmra.mxu1 %v4073_v25  ;;  %v3748_v36 = vld [vmem:[#allocation6 + $0x554] sm:$0xf0]  ;;  %v3235_v39 = vld [vmem:[#allocation6 + $0x648] sm:$0xf]  ;;  %v2980_v44 = vor.u32 %v3716_v31, %v2979_v30  ;;  %v2805_v21 = vld [vmem:[#allocation6 + $0x2f8] sm:$0xf0] }
  0xb9   :  { %1910 = vmatpush.bf16.msrb.mxu0 %v3060_v32  ;;  %1923 = vmatpush.bf16.msrb.mxu1 %v3188_v33  ;;  %v3107_v32 = vld [vmem:[#allocation6 + $0x548] sm:$0xf]  ;;  %v3780_v41 = vld [vmem:[#allocation6 + $0x654] sm:$0xf0] }
  0xba   :  { %1936 = vmatpush.bf16.msrb.mxu2 %v3316_v35  ;;  %1905 = vmatmul.bf16.vlgmr.msra.gmra.mxu3 %v4068_v15  ;;  %v3380_v35 = vor.u32 %v3816_v24, %v3379_v23  ;;  %v3812_v43 = vld [vmem:[#allocation6 + $0x754] sm:$0xf0]  ;;  %v3108_v46 = vor.u32 %v3748_v36, %v3107_v32  ;;  %v3236_v47 = vor.u32 %v3780_v41, %v3235_v39  ;;  %v3347_v57 = vld [vmem:[#allocation6 + $0x728] sm:$0xf]  ;;  %v3634_v36 = vld [vmem:[#allocation6 + $0x1cc] sm:$0xf] }
  0xbb   :  { %1949 = vmatpush.bf16.msrb.mxu3 %v3444_v42  ;;  %1892 = vmatmul.bf16.vlgmr.msra.gmra.mxu2 %v4064_v8  ;;  %v3363_v42 = vld [vmem:[#allocation6 + $0x748] sm:$0xf]  ;;  %v3744_v53 = vld [vmem:[#allocation6 + $0x534] sm:$0xf0]  ;;  %v2808_v32 = vor.u32 %v3670_v20, %v2805_v21 }
  0xbc   :  { %v3364_v52 = vor.u32 %v3812_v43, %v3363_v42  ;;  %v3776_v55 = vld [vmem:[#allocation6 + $0x634] sm:$0xf0]  ;;  %v3203_v5 = vld [vmem:[#allocation6 + $0x608] sm:$0xf]  ;;  %v1674_v22 = vpop.f32.mrf.mxu1  ;;  %v2661_v42 = vld [vmem:[#allocation6 + $0x1d8] sm:$0xf0] }
  0xbd   :  { %1911 = vmatpush.bf16.msrb.mxu0 %v3044_v48  ;;  %1924 = vmatpush.bf16.msrb.mxu1 %v3172_v49  ;;  %v2963_v48 = vld [vmem:[#allocation6 + $0x428] sm:$0xf]  ;;  %v3712_v49 = vld [vmem:[#allocation6 + $0x434] sm:$0xf0]  ;;  %v3666_v43 = vld [vmem:[#allocation6 + $0x2cc] sm:$0xf] }
  0xbe   :  { %1937 = vmatpush.bf16.msrb.mxu2 %v3300_v50  ;;  %v3091_v50 = vld [vmem:[#allocation6 + $0x528] sm:$0xf]  ;;  %v3808_v58 = vld [vmem:[#allocation6 + $0x734] sm:$0xf0]  ;;  %v2964_v61 = vor.u32 %v3712_v49, %v2963_v48  ;;  %v2664_v48 = vor.u32 %v3634_v36, %v2661_v42  ;;  %v2613_v22 = vld [vmem:[#allocation6 + $0x178] sm:$0xf0] }
  0xbf   :  { %1950 = vmatpush.bf16.msrb.mxu3 %v3428_v54  ;;  %v3219_v54 = vld [vmem:[#allocation6 + $0x628] sm:$0xf]  ;;  %v3092_v1 = vor.u32 %v3744_v53, %v3091_v50  ;;  %v3740_v4 = vld [vmem:[#allocation6 + $0x514] sm:$0xf0]  ;;  %v3348_v10 = vor.u32 %v3808_v58, %v3347_v57  ;;  %v3598_v50 = vld [vmem:[#allocation6 + $0xac] sm:$0xf] }
  0xc0   :  { %v3220_v2 = vor.u32 %v3776_v55, %v3219_v54  ;;  %v3331_v12 = vld [vmem:[#allocation6 + $0x708] sm:$0xf]  ;;  %v2645_v54 = vld [vmem:[#allocation6 + $0x1b8] sm:$0xf0]  ;;  %v3662_v55 = vld [vmem:[#allocation6 + $0x2ac] sm:$0xf] }
  0xc1   :  { %1912 = vmatpush.bf16.msrb.mxu0 %v3028_v60  ;;  %1925 = vmatpush.bf16.msrb.mxu1 %v3156_v62  ;;  %v1659_v27 = vpop.f32.mrf.mxu0  ;;  %v1698_v60 = vpop.f32.mrf.mxu3  ;;  %v2947_v62 = vld [vmem:[#allocation6 + $0x408] sm:$0xf]  ;;  %v3694_v57 = vld [vmem:[#allocation6 + $0x3ac] sm:$0xf]  ;;  %v2901_v58 = vld [vmem:[#allocation6 + $0x3b8] sm:$0xf0] }
  0xc2   :  { %1938 = vmatpush.bf16.msrb.mxu2 %v3284_v63  ;;  %v1660_v33 = vadd.f32 %v1659_v27, %v362_v18  ;;  %v3708_v63 = vld [vmem:[#allocation6 + $0x414] sm:$0xf0]  ;;  %v2933_v27 = vld [vmem:[#allocation6 + $0x3f8] sm:$0xf0] }
  0xc3   :  { %1951 = vmatpush.bf16.msrb.mxu3 %v3412_v3  ;;  %v3075_v3 = vld [vmem:[#allocation6 + $0x508] sm:$0xf]  ;;  %v2948_v18 = vor.u32 %v3708_v63, %v2947_v62  ;;  %v3594_v62 = vld [vmem:[#allocation6 + $0x8c] sm:$0xf]  ;;  %v2501_v63 = vld [vmem:[#allocation6 + $0x98] sm:$0xf0] }
  0xc4   :  { %v1673_v51 = vadd.f32 %v1672_v45, %v1660_v33  ;;  %v3076_v23 = vor.u32 %v3740_v4, %v3075_v3  ;;  %v3602_v33 = vld [vmem:[#allocation6 + $0xcc] sm:$0xf]  ;;  %v2757_v4 = vld [vmem:[#allocation6 + $0x298] sm:$0xf0] }
  0xc5   :  { %1913 = vmatpush.bf16.msrb.mxu0 %v3012_v11  ;;  %1926 = vmatpush.bf16.msrb.mxu1 %v3140_v13  ;;  %v3772_v11 = vld [vmem:[#allocation6 + $0x614] sm:$0xf0]  ;;  %v3698_v45 = vld [vmem:[#allocation6 + $0x3cc] sm:$0xf]  ;;  %v2725_v42 = vld [vmem:[#allocation6 + $0x258] sm:$0xf0] }
  0xc6   :  { %1939 = vmatpush.bf16.msrb.mxu2 %v3268_v14  ;;  %v1685_v56 = vpop.f32.mrf.mxu2  ;;  %v3804_v13 = vld [vmem:[#allocation6 + $0x714] sm:$0xf0]  ;;  %v3606_v14 = vld [vmem:[#allocation6 + $0xec] sm:$0xf]  ;;  %v3204_v24 = vor.u32 %v3772_v11, %v3203_v5  ;;  %v2504_v11 = vor.u32 %v3594_v62, %v2501_v63 }
  0xc7   :  { %1952 = vmatpush.bf16.msrb.mxu3 %v3396_v19  ;;  %v1686_v59 = vadd.f32 %v1685_v56, %v1673_v51  ;;  %v2677_v19 = vld [vmem:[#allocation6 + $0x1f8] sm:$0xf0]  ;;  %v3658_v3 = vld [vmem:[#allocation6 + $0x28c] sm:$0xf] }
  0xc8   :  { %v2680_v31 = vor.u32 %v3638_v17, %v2677_v19  ;;  %v2517_v51 = vld [vmem:[#allocation6 + $0xb8] sm:$0xf0]  ;;  %v3690_v5 = vld [vmem:[#allocation6 + $0x38c] sm:$0xf] }
  0xc9   :  { %1914 = vmatpush.bf16.msrb.mxu0 %v2996_v26  ;;  %1927 = vmatpush.bf16.msrb.mxu1 %v3124_v28  ;;  %v1661_v0 = vpop.f32.mrf.mxu0  ;;  %v4103_v7 = vadd.f32 %v1698_v60, %v1686_v59  ;;  %v3702_v26 = vld [vmem:[#allocation6 + $0x3ec] sm:$0xf]  ;;  %v3332_v28 = vor.u32 %v3804_v13, %v3331_v12  ;;  %v1700_v39 = vpop.f32.mrf.mxu3  ;;  %v2773_v56 = vld [vmem:[#allocation6 + $0x2b8] sm:$0xf0]  ;;  %v2520_v59 = vor.u32 %v3598_v50, %v2517_v51 }
  0xca   :  { %1940 = vmatpush.bf16.msrb.mxu2 %v3252_v29  ;;  %v2552_v29 = vor.u32 %v3606_v14, %v2549_v16  ;;  %v2936_v41 = vor.u32 %v3702_v26, %v2933_v27  ;;  %v3626_v0 = vld [vmem:[#allocation6 + $0x18c] sm:$0xf]  ;;  %v2760_v14 = vor.u32 %v3658_v3, %v2757_v4  ;;  %v2485_v17 = vld [vmem:[#allocation6 + $0x78] sm:$0xf0] }
  0xcb   :  { %1953 = vmatpush.bf16.msrb.mxu3 %v3380_v35  ;;  %v2533_v35 = vld [vmem:[#allocation6 + $0xd8] sm:$0xf0]  ;;  %v3590_v16 = vld [vmem:[#allocation6 + $0x6c] sm:$0xf] }
  0xcc   :  { %v3686_v26 = vld [vmem:[#allocation6 + $0x36c] sm:$0xf]  ;;  %v2869_v27 = vld [vmem:[#allocation6 + $0x378] sm:$0xf0] }
  0xcd   :  { %1915 = vmatpush.bf16.msrb.mxu0 %v2980_v44  ;;  %1928 = vmatpush.bf16.msrb.mxu1 %v3108_v46  ;;  %v2789_v44 = vld [vmem:[#allocation6 + $0x2d8] sm:$0xf0]  ;;  %v3578_v63 = vld [vmem:[#allocation6 + $0xc] sm:$0xf] }
  0xce   :  { %1941 = vmatpush.bf16.msrb.mxu2 %v3236_v47  ;;  %v1687_v30 = vpop.f32.mrf.mxu2  ;;  %v2917_v46 = vld [vmem:[#allocation6 + $0x3d8] sm:$0xf0]  ;;  %v2536_v47 = vor.u32 %v3602_v33, %v2533_v35  ;;  %v2792_v49 = vor.u32 %v3666_v43, %v2789_v44  ;;  %v3618_v35 = vld [vmem:[#allocation6 + $0x14c] sm:$0xf] }
  0xcf   :  { %1954 = vmatpush.bf16.msrb.mxu3 %v3364_v52  ;;  %v3630_v52 = vld [vmem:[#allocation6 + $0x1ac] sm:$0xf]  ;;  %v2920_v53 = vor.u32 %v3698_v45, %v2917_v46  ;;  %v2469_v33 = vld [vmem:[#allocation6 + $0x58] sm:$0xf0] }
  0xd0   :  { %v2648_v60 = vor.u32 %v3630_v52, %v2645_v54  ;;  %v2597_v39 = vld [vmem:[#allocation6 + $0x158] sm:$0xf0]  ;;  %v3682_v45 = vld [vmem:[#allocation6 + $0x34c] sm:$0xf] }
  0xd1   :  { %1916 = vmatpush.bf16.msrb.mxu0 %v2964_v61  ;;  %1929 = vmatpush.bf16.msrb.mxu1 %v3092_v1  ;;  %v2776_v61 = vor.u32 %v3662_v55, %v2773_v56  ;;  %v2904_v1 = vor.u32 %v3694_v57, %v2901_v58  ;;  %v2853_v46 = vld [vmem:[#allocation6 + $0x358] sm:$0xf0]  ;;  %v2600_v50 = vor.u32 %v3618_v35, %v2597_v39  ;;  %v3582_v52 = vld [vmem:[#allocation6 + $0x2c] sm:$0xf] }
  0xd2   :  { %1942 = vmatpush.bf16.msrb.mxu2 %v3220_v2  ;;  %v2629_v2 = vld [vmem:[#allocation6 + $0x198] sm:$0xf0]  ;;  %v3614_v54 = vld [vmem:[#allocation6 + $0x12c] sm:$0xf]  ;;  %v2856_v56 = vor.u32 %v3682_v45, %v2853_v46 }
  0xd3   :  { %1955 = vmatpush.bf16.msrb.mxu3 %v3348_v10  ;;  %v2885_v10 = vld [vmem:[#allocation6 + $0x398] sm:$0xf0]  ;;  %v2632_v13 = vor.u32 %v3626_v0, %v2629_v2  ;;  %v3646_v58 = vld [vmem:[#allocation6 + $0x22c] sm:$0xf] }
  0xd4   :  { %v2888_v21 = vor.u32 %v3690_v5, %v2885_v10  ;;  %v2581_v57 = vld [vmem:[#allocation6 + $0x138] sm:$0xf0]  ;;  %v3610_v3 = vld [vmem:[#allocation6 + $0x10c] sm:$0xf] }
  0xd5   :  { %1917 = vmatpush.bf16.msrb.mxu0 %v2948_v18  ;;  %1930 = vmatpush.bf16.msrb.mxu1 %v3076_v23  ;;  %v1711_v12 = vpop.f32.mrf.mxu0  ;;  %v3622_v18 = vld [vmem:[#allocation6 + $0x16c] sm:$0xf]  ;;  %v1724_v20 = vpop.f32.mrf.mxu1  ;;  %v2437_v0 = vld [vmem:[#allocation6 + $0x18] sm:$0xf0] }
  0xd6   :  { %1943 = vmatpush.bf16.msrb.mxu2 %v3204_v24  ;;  %v1712_v19 = vadd.f32 %v1711_v12, %v4103_v7  ;;  %v3654_v23 = vld [vmem:[#allocation6 + $0x26c] sm:$0xf]  ;;  %v2741_v24 = vld [vmem:[#allocation6 + $0x278] sm:$0xf0]  ;;  %v2616_v30 = vor.u32 %v3622_v18, %v2613_v22  ;;  %v2872_v7 = vor.u32 %v3686_v26, %v2869_v27 }
  0xd7   :  { %1956 = vmatpush.bf16.msrb.mxu3 %v3332_v28  ;;  %v2565_v4 = vld [vmem:[#allocation6 + $0x118] sm:$0xf0]  ;;  %v3642_v5 = vld [vmem:[#allocation6 + $0x20c] sm:$0xf] }
  0xd8   :  { %1918 = vmatmul.bf16.vlgmr.msrb.gmra.mxu0 %v4078_v37  ;;  %1931 = vmatmul.bf16.vlgmr.msrb.gmra.mxu1 %v4082_v40  ;;  %v1725_v28 = vadd.f32 %v1724_v20, %v1712_v19  ;;  %v2693_v12 = vld [vmem:[#allocation6 + $0x218] sm:$0xf0]  ;;  %v3766_v19 = vld [vmem:[#allocation6 + $0x5ec] sm:$0xf]  ;;  %v2440_v20 = vor.u32 %v3578_v63, %v2437_v0 }
  0xd9   :  { %1962 = vmatpush.bf16.msra.mxu0 %v2552_v29  ;;  %1975 = vmatpush.bf16.msra.mxu1 %v2680_v31  ;;  %v2488_v29 = vor.u32 %v3590_v16, %v2485_v17  ;;  %v2744_v31 = vor.u32 %v3654_v23, %v2741_v24  ;;  %v3734_v17 = vld [vmem:[#allocation6 + $0x4ec] sm:$0xf]  ;;  %v3061_v18 = vld [vmem:[#allocation6 + $0x4f8] sm:$0xf0]  ;;  %v2568_v24 = vor.u32 %v3610_v3, %v2565_v4 }
  0xda   :  { %1988 = vmatpush.bf16.msra.mxu2 %v2808_v32  ;;  %1957 = vmatmul.bf16.vlgmr.msrb.gmra.mxu3 %v4080_v38  ;;  %v3586_v32 = vld [vmem:[#allocation6 + $0x4c] sm:$0xf]  ;;  %v3317_v23 = vld [vmem:[#allocation6 + $0x6f8] sm:$0xf0]  ;;  %v2696_v26 = vor.u32 %v3642_v5, %v2693_v12 }
  0xdb   :  { %2001 = vmatpush.bf16.msra.mxu3 %v2936_v41  ;;  %1944 = vmatmul.bf16.vlgmr.msrb.gmra.mxu2 %v4076_v34  ;;  %v3650_v41 = vld [vmem:[#allocation6 + $0x24c] sm:$0xf]  ;;  %v3045_v35 = vld [vmem:[#allocation6 + $0x4d8] sm:$0xf0] }
  0xdc   :  { %v2728_v51 = vor.u32 %v3650_v41, %v2725_v42  ;;  %v3798_v22 = vld [vmem:[#allocation6 + $0x6ec] sm:$0xf]  ;;  %v3173_v39 = vld [vmem:[#allocation6 + $0x5d8] sm:$0xf0] }
  0xdd   :  { %1963 = vmatpush.bf16.msra.mxu0 %v2536_v47  ;;  %1976 = vmatpush.bf16.msra.mxu1 %v2664_v48  ;;  %v1750_v44 = vpop.f32.mrf.mxu3  ;;  %v2472_v47 = vor.u32 %v3586_v32, %v2469_v33  ;;  %v1726_v55 = vpop.f32.mrf.mxu1  ;;  %v3830_v27 = vld [vmem:[#allocation6 + $0x7ec] sm:$0xf]  ;;  %v3320_v32 = vor.u32 %v3798_v22, %v3317_v23  ;;  %v3301_v42 = vld [vmem:[#allocation6 + $0x6d8] sm:$0xf0] }
  0xde   :  { %1989 = vmatpush.bf16.msra.mxu2 %v2792_v49  ;;  %v1737_v36 = vpop.f32.mrf.mxu2  ;;  %v1713_v49 = vpop.f32.mrf.mxu0  ;;  %v3730_v33 = vld [vmem:[#allocation6 + $0x4cc] sm:$0xf]  ;;  %v3285_v55 = vld [vmem:[#allocation6 + $0x6b8] sm:$0xf0] }
  0xdf   :  { %2002 = vmatpush.bf16.msra.mxu3 %v2920_v53  ;;  %v1738_v43 = vadd.f32 %v1737_v36, %v1725_v28  ;;  %v2453_v53 = vld [vmem:[#allocation6 + $0x38] sm:$0xf0]  ;;  %v3762_v36 = vld [vmem:[#allocation6 + $0x5cc] sm:$0xf]  ;;  %v3048_v45 = vor.u32 %v3730_v33, %v3045_v35 }
  0xe0   :  { %v2456_v62 = vor.u32 %v3582_v52, %v2453_v53  ;;  %v3445_v28 = vld [vmem:[#allocation6 + $0x7f8] sm:$0xf0]  ;;  %v3794_v41 = vld [vmem:[#allocation6 + $0x6cc] sm:$0xf]  ;;  %v3176_v46 = vor.u32 %v3762_v36, %v3173_v39 }
  0xe1   :  { %1964 = vmatpush.bf16.msra.mxu0 %v2520_v59  ;;  %1977 = vmatpush.bf16.msra.mxu1 %v2648_v60  ;;  %v4110_v48 = vadd.f32 %v1750_v44, %v1738_v43  ;;  %v2709_v59 = vld [vmem:[#allocation6 + $0x238] sm:$0xf0]  ;;  %v3678_v60 = vld [vmem:[#allocation6 + $0x32c] sm:$0xf] }
  0xe2   :  { %1990 = vmatpush.bf16.msra.mxu2 %v2776_v61  ;;  %v2837_v61 = vld [vmem:[#allocation6 + $0x338] sm:$0xf0]  ;;  %v2712_v2 = vor.u32 %v3646_v58, %v2709_v59  ;;  %v3826_v43 = vld [vmem:[#allocation6 + $0x7cc] sm:$0xf] }
  0xe3   :  { %2003 = vmatpush.bf16.msra.mxu3 %v2904_v1  ;;  %v2584_v1 = vor.u32 %v3614_v54, %v2581_v57  ;;  %v3429_v44 = vld [vmem:[#allocation6 + $0x7d8] sm:$0xf0]  ;;  %v3726_v49 = vld [vmem:[#allocation6 + $0x4ac] sm:$0xf] }
  0xe4   :  { %v3432_v52 = vor.u32 %v3826_v43, %v3429_v44  ;;  %v3157_v53 = vld [vmem:[#allocation6 + $0x5b8] sm:$0xf0]  ;;  %v3790_v54 = vld [vmem:[#allocation6 + $0x6ac] sm:$0xf] }
  0xe5   :  { %1965 = vmatpush.bf16.msra.mxu0 %v2504_v11  ;;  %1978 = vmatpush.bf16.msra.mxu1 %v2632_v13  ;;  %v2840_v11 = vor.u32 %v3678_v60, %v2837_v61  ;;  %v3674_v13 = vld [vmem:[#allocation6 + $0x30c] sm:$0xf]  ;;  %v1752_v16 = vpop.f32.mrf.mxu3  ;;  %v3413_v57 = vld [vmem:[#allocation6 + $0x7b8] sm:$0xf0]  ;;  %v3288_v60 = vor.u32 %v3790_v54, %v3285_v55  ;;  %v363_v54 = vperm.slane %v4100_v6, 1 }
  0xe6   :  { %1991 = vmatpush.bf16.msra.mxu2 %v2760_v14  ;;  %v1739_v10 = vpop.f32.mrf.mxu2  ;;  %v2821_v14 = vld [vmem:[#allocation6 + $0x318] sm:$0xf0]  ;;  %v3722_v61 = vld [vmem:[#allocation6 + $0x48c] sm:$0xf] }
  0xe7   :  { %2004 = vmatpush.bf16.msra.mxu3 %v2888_v21  ;;  %v3189_v21 = vld [vmem:[#allocation6 + $0x5f8] sm:$0xf0]  ;;  %v3818_v3 = vld [vmem:[#allocation6 + $0x78c] sm:$0xf] }
  0xe8   :  { %v3141_v0 = vld [vmem:[#allocation6 + $0x598] sm:$0xf0]  ;;  %v3718_v10 = vld [vmem:[#allocation6 + $0x46c] sm:$0xf] }
  0xe9   :  { %1966 = vmatpush.bf16.msra.mxu0 %v2488_v29  ;;  %1979 = vmatpush.bf16.msra.mxu1 %v2616_v30  ;;  %v2824_v29 = vor.u32 %v3674_v13, %v2821_v14  ;;  %v3064_v30 = vor.u32 %v3734_v17, %v3061_v18  ;;  %v3750_v12 = vld [vmem:[#allocation6 + $0x56c] sm:$0xf]  ;;  %v3125_v16 = vld [vmem:[#allocation6 + $0x578] sm:$0xf0] }
  0xea   :  { %1992 = vmatpush.bf16.msra.mxu2 %v2744_v31  ;;  %v3192_v31 = vor.u32 %v3766_v19, %v3189_v21  ;;  %v3782_v17 = vld [vmem:[#allocation6 + $0x66c] sm:$0xf]  ;;  %v3253_v18 = vld [vmem:[#allocation6 + $0x678] sm:$0xf0]  ;;  %v3128_v22 = vor.u32 %v3750_v12, %v3125_v16  ;;  %v3839_v16 = vld [vmem:[#allocation9 + $0x30] sm:$0xff] }
  0xeb   :  { %2005 = vmatpush.bf16.msra.mxu3 %v2872_v7  ;;  %v3448_v7 = vor.u32 %v3830_v27, %v3445_v28  ;;  %v3814_v19 = vld [vmem:[#allocation6 + $0x76c] sm:$0xf]  ;;  %v3256_v23 = vor.u32 %v3782_v17, %v3253_v18  ;;  %v3365_v36 = vld [vmem:[#allocation6 + $0x758] sm:$0xf0] }
  0xec   :  { %v3746_v27 = vld [vmem:[#allocation6 + $0x54c] sm:$0xf]  ;;  %v2965_v44 = vld [vmem:[#allocation6 + $0x438] sm:$0xf0] }
  0xed   :  { %1967 = vmatpush.bf16.msra.mxu0 %v2472_v47  ;;  %1980 = vmatpush.bf16.msra.mxu1 %v2600_v50  ;;  %v3304_v47 = vor.u32 %v3794_v41, %v3301_v42  ;;  %v3029_v50 = vld [vmem:[#allocation6 + $0x4b8] sm:$0xf0]  ;;  %v3810_v35 = vld [vmem:[#allocation6 + $0x74c] sm:$0xf] }
  0xee   :  { %1993 = vmatpush.bf16.msra.mxu2 %v2728_v51  ;;  %v3758_v51 = vld [vmem:[#allocation6 + $0x5ac] sm:$0xf]  ;;  %v3032_v58 = vor.u32 %v3726_v49, %v3029_v50  ;;  %v3093_v49 = vld [vmem:[#allocation6 + $0x538] sm:$0xf0] }
  0xef   :  { %2006 = vmatpush.bf16.msra.mxu3 %v2856_v56  ;;  %v3822_v56 = vld [vmem:[#allocation6 + $0x7ac] sm:$0xf]  ;;  %v3160_v59 = vor.u32 %v3758_v51, %v3157_v53  ;;  %v3221_v51 = vld [vmem:[#allocation6 + $0x638] sm:$0xf0] }
  0xf0   :  { %v3416_v63 = vor.u32 %v3822_v56, %v3413_v57  ;;  %v3710_v43 = vld [vmem:[#allocation6 + $0x42c] sm:$0xf]  ;;  %v3349_v53 = vld [vmem:[#allocation6 + $0x738] sm:$0xf0] }
  0xf1   :  { %1968 = vmatpush.bf16.msra.mxu0 %v2456_v62  ;;  %1981 = vmatpush.bf16.msra.mxu1 %v2584_v1  ;;  %v3013_v62 = vld [vmem:[#allocation6 + $0x498] sm:$0xf0]  ;;  %v3786_v1 = vld [vmem:[#allocation6 + $0x68c] sm:$0xf]  ;;  %v2968_v55 = vor.u32 %v3710_v43, %v2965_v44 }
  0xf2   :  { %1994 = vmatpush.bf16.msra.mxu2 %v2712_v2  ;;  %v3269_v2 = vld [vmem:[#allocation6 + $0x698] sm:$0xf0]  ;;  %v3774_v50 = vld [vmem:[#allocation6 + $0x62c] sm:$0xf] }
  0xf3   :  { %2007 = vmatpush.bf16.msra.mxu3 %v2840_v11  ;;  %v3272_v5 = vor.u32 %v3786_v1, %v3269_v2  ;;  %v2997_v11 = vld [vmem:[#allocation6 + $0x478] sm:$0xf0]  ;;  %v3224_v57 = vor.u32 %v3774_v50, %v3221_v51  ;;  %v3802_v2 = vld [vmem:[#allocation6 + $0x70c] sm:$0xf] }
  0xf4   :  { %v3000_v21 = vor.u32 %v3718_v10, %v2997_v11  ;;  %v3840_v11 = vld [vmem:[#allocation9 + $0x38] sm:$0xff] }
  0xf5   :  { %1969 = vmatpush.bf16.msra.mxu0 %v2440_v20  ;;  %1982 = vmatpush.bf16.msra.mxu1 %v2568_v24  ;;  %v4116_v4 = vpop.f32.mrf.mxu0  ;;  %v4118_v13 = vpop.f32.mrf.mxu1  ;;  %v3381_v20 = vld [vmem:[#allocation6 + $0x778] sm:$0xf0]  ;;  %v3714_v24 = vld [vmem:[#allocation6 + $0x44c] sm:$0xf] }
  0xf6   :  { %1995 = vmatpush.bf16.msra.mxu2 %v2696_v26  ;;  %v2981_v26 = vld [vmem:[#allocation6 + $0x458] sm:$0xf0] }
  0xf7   :  { %2008 = vmatpush.bf16.msra.mxu3 %v2824_v29  ;;  %v3384_v29 = vor.u32 %v3814_v19, %v3381_v20  ;;  %v3848_v12 = vld [vmem:[#allocation9 + $0x78] sm:$0xff]  ;;  %v3846_v20 = vld [vmem:[#allocation9 + $0x68] sm:$0xff] }
  0xf8   :  { %1970 = vmatmul.bf16.vlgmr.msra.gmra.mxu0 %v4066_v9  ;;  %1983 = vmatmul.bf16.vlgmr.msra.gmra.mxu1 %v4073_v25  ;;  %v3397_v9 = vld [vmem:[#allocation6 + $0x798] sm:$0xf0] }
  0xf9   :  { %2014 = vmatpush.bf16.msrb.mxu0 %v3064_v30  ;;  %2027 = vmatpush.bf16.msrb.mxu1 %v3192_v31  ;;  %v3400_v14 = vor.u32 %v3818_v3, %v3397_v9  ;;  %v3109_v30 = vld [vmem:[#allocation6 + $0x558] sm:$0xf0]  ;;  %v3778_v31 = vld [vmem:[#allocation6 + $0x64c] sm:$0xf]  ;;  %v1764_v9 = vadd.f32 %v4116_v4, %v363_v54  ;;  %v3847_v4 = vld [vmem:[#allocation9 + $0x70] sm:$0xff] }
  0xfa   :  { %2040 = vmatpush.bf16.msrb.mxu2 %v3320_v32  ;;  %2009 = vmatmul.bf16.vlgmr.msra.gmra.mxu3 %v4068_v15  ;;  %v3016_v15 = vor.u32 %v3722_v61, %v3013_v62  ;;  %v3237_v32 = vld [vmem:[#allocation6 + $0x658] sm:$0xf0]  ;;  %v3112_v41 = vor.u32 %v3746_v27, %v3109_v30  ;;  %v3835_v30 = vld [vmem:[#allocation9 + $0x10] sm:$0xff] }
  0xfb   :  { %2053 = vmatpush.bf16.msrb.mxu3 %v3448_v7  ;;  %1996 = vmatmul.bf16.vlgmr.msra.gmra.mxu2 %v4064_v8  ;;  %v3754_v8 = vld [vmem:[#allocation6 + $0x58c] sm:$0xf]  ;;  %v2984_v7 = vor.u32 %v3714_v24, %v2981_v26  ;;  %v3240_v42 = vor.u32 %v3778_v31, %v3237_v32  ;;  %v3333_v3 = vld [vmem:[#allocation6 + $0x718] sm:$0xf0]  ;;  %v3855_v26 = vld [vmem:[#allocation9 + $0xb0] sm:$0xff] }
  0xfc   :  { %v3144_v25 = vor.u32 %v3754_v8, %v3141_v0  ;;  %v3077_v8 = vld [vmem:[#allocation6 + $0x518] sm:$0xf0]  ;;  %v3336_v10 = vor.u32 %v3802_v2, %v3333_v3  ;;  %v3851_v54 = vld [vmem:[#allocation9 + $0x90] sm:$0xff] }
  0xfd   :  { %2015 = vmatpush.bf16.msrb.mxu0 %v3048_v45  ;;  %2028 = vmatpush.bf16.msrb.mxu1 %v3176_v46  ;;  %v4122_v33 = vpop.f32.mrf.mxu3  ;;  %v1765_v39 = vpop.f32.mrf.mxu0  ;;  %v3742_v45 = vld [vmem:[#allocation6 + $0x52c] sm:$0xf]  ;;  %v3205_v0 = vld [vmem:[#allocation6 + $0x618] sm:$0xf0] }
  0xfe   :  { %2041 = vmatpush.bf16.msrb.mxu2 %v3304_v47  ;;  %v4120_v28 = vpop.f32.mrf.mxu2  ;;  %v1778_v46 = vpop.f32.mrf.mxu1  ;;  %v3368_v47 = vor.u32 %v3810_v35, %v3365_v36  ;;  %v3096_v56 = vor.u32 %v3742_v45, %v3093_v49  ;;  %v3856_v17 = vld [vmem:[#allocation9 + $0xb8] sm:$0xff]  ;;  %v3843_v35 = vld [vmem:[#allocation9 + $0x50] sm:$0xff]  ;;  %v3834_v39 = vld [vmem:[#allocation9 + $0x8] sm:$0xff] }
  0xff   :  { %2054 = vmatpush.bf16.msrb.mxu3 %v3432_v52  ;;  %v3806_v52 = vld [vmem:[#allocation6 + $0x72c] sm:$0xf]  ;;  %v3833_v46 = vld [vmem:[#allocation9] sm:$0xff] }
 0x100   :  { %v3352_v62 = vor.u32 %v3806_v52, %v3349_v53  ;;  %v3841_v49 = vld [vmem:[#allocation9 + $0x40] sm:$0xff] }
 0x101   :  { %2016 = vmatpush.bf16.msrb.mxu0 %v3032_v58  ;;  %2029 = vmatpush.bf16.msrb.mxu1 %v3160_v59  ;;  %v3706_v58 = vld [vmem:[#allocation6 + $0x40c] sm:$0xf]  ;;  %v2949_v59 = vld [vmem:[#allocation6 + $0x418] sm:$0xf0] }
 0x102   :  { %2042 = vmatpush.bf16.msrb.mxu2 %v3288_v60  ;;  %v3738_v60 = vld [vmem:[#allocation6 + $0x50c] sm:$0xf] }
 0x103   :  { %2055 = vmatpush.bf16.msrb.mxu3 %v3416_v63  ;;  %v3770_v63 = vld [vmem:[#allocation6 + $0x60c] sm:$0xf] }
 0x105   :  { %2017 = vmatpush.bf16.msrb.mxu0 %v3016_v15  ;;  %2030 = vmatpush.bf16.msrb.mxu1 %v3144_v25  ;;  %v1804_v1 = vpop.f32.mrf.mxu3  ;;  %v2952_v15 = vor.u32 %v3706_v58, %v2949_v59  ;;  %v3080_v25 = vor.u32 %v3738_v60, %v3077_v8  ;;  %v3849_v60 = vld [vmem:[#allocation9 + $0x80] sm:$0xff] }
 0x106   :  { %2043 = vmatpush.bf16.msrb.mxu2 %v3272_v5  ;;  %v1791_v61 = vpop.f32.mrf.mxu2  ;;  %v3208_v5 = vor.u32 %v3770_v63, %v3205_v0 }
 0x107   :  { %2056 = vmatpush.bf16.msrb.mxu3 %v3400_v14  ;;  %v1777_v14 = vadd.f32 %v4118_v13, %v1764_v9  ;;  %v3838_v13 = vld [vmem:[#allocation9 + $0x28] sm:$0xff] }
 0x109   :  { %2018 = vmatpush.bf16.msrb.mxu0 %v3000_v21  ;;  %2031 = vmatpush.bf16.msrb.mxu1 %v3128_v22  ;;  %v1790_v18 = vadd.f32 %v4120_v28, %v1777_v14  ;;  %v3837_v21 = vld [vmem:[#allocation9 + $0x20] sm:$0xff] }
 0x10a   :  { %2044 = vmatpush.bf16.msrb.mxu2 %v3256_v23 }
 0x10b   :  { %2057 = vmatpush.bf16.msrb.mxu3 %v3384_v29  ;;  %v1803_v19 = vadd.f32 %v4122_v33, %v1790_v18  ;;  %v3854_v29 = vld [vmem:[#allocation9 + $0xa8] sm:$0xff]  ;;  %v3853_v33 = vld [vmem:[#allocation9 + $0xa0] sm:$0xff] }
 0x10d   :  { %2019 = vmatpush.bf16.msrb.mxu0 %v2984_v7  ;;  %2032 = vmatpush.bf16.msrb.mxu1 %v3112_v41  ;;  %v3852_v41 = vld [vmem:[#allocation9 + $0x98] sm:$0xff] }
 0x10e   :  { %2045 = vmatpush.bf16.msrb.mxu2 %v3240_v42  ;;  %v3842_v42 = vld [vmem:[#allocation9 + $0x48] sm:$0xff] }
 0x10f   :  { %2058 = vmatpush.bf16.msrb.mxu3 %v3368_v47  ;;  %v2066_v47 = vmax.f32 %v4110_v48, 0.0  ;;  %v364_v48 = vperm.slane %v4100_v6, 2 }
 0x111   :  { %2020 = vmatpush.bf16.msrb.mxu0 %v2968_v55  ;;  %2033 = vmatpush.bf16.msrb.mxu1 %v3096_v56  ;;  %v2070_v51 = vpack.c.bf16 %v2066_v47, %v2066_v47 }
 0x112   :  { %2046 = vmatpush.bf16.msrb.mxu2 %v3224_v57  ;;  %v3850_v57 = vld [vmem:[#allocation9 + $0x88] sm:$0xff] }
 0x113   :  { %2059 = vmatpush.bf16.msrb.mxu3 %v3352_v62 }
 0x115   :  { %2021 = vmatpush.bf16.msrb.mxu0 %v2952_v15  ;;  %2034 = vmatpush.bf16.msrb.mxu1 %v3080_v25  ;;  %v1815_v22 = vpop.f32.mrf.mxu0  ;;  %v1828_v24 = vpop.f32.mrf.mxu1 }
 0x116   :  { %2047 = vmatpush.bf16.msrb.mxu2 %v3208_v5  ;;  %v1816_v23 = vadd.f32 %v1815_v22, %v1803_v19  ;;  %v3860_v22 = vld [vmem:[#allocation9 + $0xd8] sm:$0xff] }
 0x117   :  { %2060 = vmatpush.bf16.msrb.mxu3 %v3336_v10 }
 0x118   :  { %2022 = vmatmul.bf16.vlgmr.msrb.gmra.mxu0 %v4078_v37  ;;  %2035 = vmatmul.bf16.vlgmr.msrb.gmra.mxu1 %v4082_v40  ;;  %v3845_v37 = vld [vmem:[#allocation9 + $0x60] sm:$0xff]  ;;  %v1829_v40 = vadd.f32 %v1828_v24, %v1816_v23 }
 0x119   :  { %2334 = vmatpush.bf16.msra.mxu0 %v3840_v11  ;;  %2347 = vmatpush.bf16.msra.mxu1 %v3848_v12  ;;  %v3864_v11 = vld [vmem:[#allocation9 + $0xf8] sm:$0xff] }
 0x11a   :  { %2048 = vmatmul.bf16.vlgmr.msrb.gmra.mxu2 %v4076_v34  ;;  %2061 = vmatmul.bf16.vlgmr.msrb.gmra.mxu3 %v4080_v38  ;;  %v3836_v34 = vld [vmem:[#allocation9 + $0x18] sm:$0xff] }
 0x11b   :  { %2360 = vmatpush.bf16.msra.mxu2 %v3856_v17  ;;  %v3844_v38 = vld [vmem:[#allocation9 + $0x58] sm:$0xff]  ;;  %2373 = vmatpush.bf16.msra.mxu3 %v3864_v11 }
 0x11d   :  { %2335 = vmatpush.bf16.msra.mxu0 %v3839_v16  ;;  %2348 = vmatpush.bf16.msra.mxu1 %v3847_v4  ;;  %v1854_v28 = vpop.f32.mrf.mxu3  ;;  %v1817_v32 = vpop.f32.mrf.mxu0  ;;  %v3863_v16 = vld [vmem:[#allocation9 + $0xf0] sm:$0xff] }
 0x11e   :  { %v1841_v27 = vpop.f32.mrf.mxu2  ;;  %v1830_v36 = vpop.f32.mrf.mxu1 }
 0x11f   :  { %2361 = vmatpush.bf16.msra.mxu2 %v3855_v26  ;;  %v1842_v31 = vadd.f32 %v1841_v27, %v1829_v40  ;;  %2374 = vmatpush.bf16.msra.mxu3 %v3863_v16  ;;  %v3858_v26 = vld [vmem:[#allocation9 + $0xc8] sm:$0xff]  ;;  %v3857_v27 = vld [vmem:[#allocation9 + $0xc0] sm:$0xff] }
 0x121   :  { %2336 = vmatpush.bf16.msra.mxu0 %v3838_v13  ;;  %2349 = vmatpush.bf16.msra.mxu1 %v3846_v20  ;;  %v1855_v7 = vadd.f32 %v1854_v28, %v1842_v31  ;;  %v3862_v13 = vld [vmem:[#allocation9 + $0xe8] sm:$0xff] }
 0x123   :  { %2362 = vmatpush.bf16.msra.mxu2 %v3854_v29  ;;  %v2067_v45 = vmax.f32 %v1855_v7, 0.0  ;;  %2375 = vmatpush.bf16.msra.mxu3 %v3862_v13  ;;  %v365_v29 = vperm.slane %v4100_v6, 3 }
 0x125   :  { %2337 = vmatpush.bf16.msra.mxu0 %v3837_v21  ;;  %2350 = vmatpush.bf16.msra.mxu1 %v3845_v37  ;;  %v1856_v44 = vpop.f32.mrf.mxu3  ;;  %v2071_v50 = vpack.c.bf16 %v2067_v45, %v2067_v45  ;;  %v3861_v21 = vld [vmem:[#allocation9 + $0xe0] sm:$0xff]  ;;  %v3859_v37 = vld [vmem:[#allocation9 + $0xd0] sm:$0xff] }
 0x126   :  { %v1843_v43 = vpop.f32.mrf.mxu2 }
 0x127   :  { %2363 = vmatpush.bf16.msra.mxu2 %v3853_v33  ;;  %2376 = vmatpush.bf16.msra.mxu3 %v3861_v21 }
 0x129   :  { %2338 = vmatpush.bf16.msra.mxu0 %v3836_v34  ;;  %2351 = vmatpush.bf16.msra.mxu1 %v3844_v38 }
 0x12b   :  { %2364 = vmatpush.bf16.msra.mxu2 %v3852_v41  ;;  %2377 = vmatpush.bf16.msra.mxu3 %v3860_v22 }
 0x12d   :  { %2339 = vmatpush.bf16.msra.mxu0 %v3835_v30  ;;  %2352 = vmatpush.bf16.msra.mxu1 %v3843_v35 }
 0x12f   :  { %2365 = vmatpush.bf16.msra.mxu2 %v3851_v54  ;;  %2378 = vmatpush.bf16.msra.mxu3 %v3859_v37 }
 0x131   :  { %2340 = vmatpush.bf16.msra.mxu0 %v3834_v39  ;;  %2353 = vmatpush.bf16.msra.mxu1 %v3842_v42 }
 0x133   :  { %2366 = vmatpush.bf16.msra.mxu2 %v3850_v57  ;;  %2379 = vmatpush.bf16.msra.mxu3 %v3858_v26 }
 0x135   :  { %2341 = vmatpush.bf16.msra.mxu0 %v3833_v46  ;;  %2354 = vmatpush.bf16.msra.mxu1 %v3841_v49  ;;  %v1867_v52 = vpop.f32.mrf.mxu0  ;;  %v1880_v53 = vpop.f32.mrf.mxu1 }
 0x136   :  { %v1868_v8 = vadd.f32 %v1867_v52, %v364_v48 }
 0x137   :  { %2367 = vmatpush.bf16.msra.mxu2 %v3849_v60  ;;  %2380 = vmatpush.bf16.msra.mxu3 %v3857_v27 }
 0x138   :  { %2342 = vmatmul.bf16.vlgmr.msra.gmra.mxu0 %v2070_v51  ;;  %2355 = vmatmul.bf16.vlgmr.msra.gmra.mxu1 %v2071_v50  ;;  %v1881_v63 = vadd.f32 %v1880_v53, %v1868_v8  ;;  %v3874_v53 = vld [vmem:[%s4152_s4] ss:$0 sm:$0xff] }
 0x13d   :  { %v1906_v56 = vpop.f32.mrf.mxu3  ;;  %v1869_v58 = vpop.f32.mrf.mxu0 }
 0x13e   :  { %v1893_v55 = vpop.f32.mrf.mxu2  ;;  %v1882_v59 = vpop.f32.mrf.mxu1 }
 0x13f   :  { %v1894_v0 = vadd.f32 %v1893_v55, %v1881_v63 }
 0x141   :  { %v1907_v1 = vadd.f32 %v1906_v56, %v1894_v0 }
 0x145   :  { %v1908_v62 = vpop.f32.mrf.mxu3 }
 0x146   :  { %v1895_v61 = vpop.f32.mrf.mxu2 }
 0x155   :  { %v1919_v2 = vpop.f32.mrf.mxu0  ;;  %v1932_v9 = vpop.f32.mrf.mxu1 }
 0x156   :  { %v1920_v3 = vadd.f32 %v1919_v2, %v1907_v1  ;;  %v2387_v2 = vld [vmem:[%s4153_s5] sm:$0x1] }
 0x158   :  { %v1933_v15 = vadd.f32 %v1932_v9, %v1920_v3  ;;  %v2390_v3 = vstv %s4154_s6 }
 0x15d   :  { %v1958_v10 = vpop.f32.mrf.mxu3  ;;  %v1921_v14 = vpop.f32.mrf.mxu0 }
 0x15e   :  { %v1945_v25 = vpop.f32.mrf.mxu2  ;;  %v1934_v17 = vpop.f32.mrf.mxu1 }
 0x15f   :  { %v1946_v5 = vadd.f32 %v1945_v25, %v1933_v15 }
 0x161   :  { %v1959_v12 = vadd.f32 %v1958_v10, %v1946_v5 }
 0x163   :  { %v2068_v4 = vmax.f32 %v1959_v12, 0.0 }
 0x165   :  { %v2072_v18 = vpack.c.bf16 %v2068_v4, %v2068_v4  ;;  %v1960_v20 = vpop.f32.mrf.mxu3 }
 0x166   :  { %v1947_v19 = vpop.f32.mrf.mxu2 }
 0x167   :  { %2368 = vmatmul.bf16.vlgmr.msra.gmra.mxu2 %v2072_v18 }
 0x175   :  { %v1971_v23 = vpop.f32.mrf.mxu0  ;;  %v1984_v24 = vpop.f32.mrf.mxu1 }
 0x176   :  { %v1972_v32 = vadd.f32 %v1971_v23, %v365_v29 }
 0x178   :  { %v1985_v33 = vadd.f32 %v1984_v24, %v1972_v32 }
 0x17d   :  { %v2010_v40 = vpop.f32.mrf.mxu3  ;;  %v1973_v38 = vpop.f32.mrf.mxu0 }
 0x17e   :  { %v1997_v34 = vpop.f32.mrf.mxu2  ;;  %v1986_v28 = vpop.f32.mrf.mxu1 }
 0x17f   :  { %v1998_v35 = vadd.f32 %v1997_v34, %v1985_v33 }
 0x181   :  { %v2011_v36 = vadd.f32 %v2010_v40, %v1998_v35 }
 0x185   :  { %v2012_v31 = vpop.f32.mrf.mxu3 }
 0x186   :  { %v1999_v30 = vpop.f32.mrf.mxu2 }
 0x195   :  { %v2023_v7 = vpop.f32.mrf.mxu0  ;;  %v2036_v39 = vpop.f32.mrf.mxu1 }
 0x196   :  { %v2024_v41 = vadd.f32 %v2023_v7, %v2011_v36 }
 0x198   :  { %v2037_v42 = vadd.f32 %v2036_v39, %v2024_v41 }
 0x19d   :  { %v2049_v43 = vpop.f32.mrf.mxu2  ;;  %v2062_v45 = vpop.f32.mrf.mxu3 }
 0x19e   :  { %v2050_v44 = vadd.f32 %v2049_v43, %v2037_v42  ;;  %v2025_v46 = vpop.f32.mrf.mxu0  ;;  %v2038_v47 = vpop.f32.mrf.mxu1 }
 0x1a0   :  { %v2063_v49 = vadd.f32 %v2062_v45, %v2050_v44 }
 0x1a2   :  { %v2069_v50 = vmax.f32 %v2063_v49, 0.0 }
 0x1a4   :  { %v2073_v51 = vpack.c.bf16 %v2069_v50, %v2069_v50 }
 0x1a5   :  { %v2051_v52 = vpop.f32.mrf.mxu2  ;;  %v2064_v6 = vpop.f32.mrf.mxu3 }
 0x1a6   :  { %2381 = vmatmul.bf16.vlgmr.msra.gmra.mxu3 %v2073_v51 }
 0x1b5   :  { %v2343_v54 = vpop.f32.mrf.mxu0  ;;  %v2356_v56 = vpop.f32.mrf.mxu1 }
 0x1b6   :  { %v2344_v55 = vadd.f32 %v3874_v53, %v2343_v54 }
 0x1b8   :  { %v2357_v57 = vadd.f32 %v2356_v56, %v2344_v55 }
 0x1bd   :  { %v2345_v58 = vpop.f32.mrf.mxu0  ;;  %v2358_v59 = vpop.f32.mrf.mxu1 }
 0x1ea   :  { %v2369_v60 = vpop.f32.mrf.mxu2 }
 0x1eb   :  { %v2370_v61 = vadd.f32 %v2369_v60, %v2357_v57 }
 0x1f2   :  { %v2371_v48 = vpop.f32.mrf.mxu2 }
 0x229   :  { %v2382_v62 = vpop.f32.mrf.mxu3 }
 0x22a   :  { %v2383_v8 = vadd.f32 %v2382_v62, %v2370_v61 }
 0x22c   :  { %v2386_v63 = vmax.f32 %v2383_v8, 0.0 }
 0x22e   :  { %v2388_v0 = vpack.c.bf16 %v2386_v63, %v2386_v63 }
 0x230   :  { %2398 = vmatpush.bf16.xpose.msrb.mxu0 %v2388_v0 }
 0x231   :  { %v2384_v1 = vpop.f32.mrf.mxu3 }
 0x237   :  { %2399 = vmatmul.bf16.vlgmr.msrb.gmra.mxu0 %v2387_v2 }
 0x2b4   :  { %v2400_v9 = vpop.f32.mrf.mxu0 }
 0x2b5   :  { %v2401_v15 = vadd.f32 %v2400_v9, %v2390_v3 }
 0x2b7   :  { %2405 = vst.msk [vmem:[#allocation11] sm:$0x1] %vm2404_vm0, %v2401_v15 }
 0x2b8   :  { %2416 = dma.vmem_to_hbm [thread:$0]  %s2412_s27, 16, %s2414_s30, [#allocation5]  }
 0x2bc   :  { %v2402_v25 = vpop.f32.mrf.mxu0 }
 0x2bd   :  { %4001 = dma.done.wait [#allocation5], 16  }
 0x2be   :  { %4002 = vsyncadd [#allocation5], 4294967280 }
 0x2bf   :  { %2421 = vsyncpa [#allocation4], 1 }
 0x2c0   :  { %2422 = vsyncpa [#allocation7], 1 }
 0x2c1   :  { %2423 = vsyncpa [#allocation10], 1 }
 0x2c2   :  { %2424 = vsyncpa [#allocation5], 1 }

</bundles_post_ra>
